<compile_context>
chip_gen: v5e
topology: v5e:2x2
jax: 0.10.0
libtpu: 0.0.40
codegen_flags: <defaults>
</compile_context>

<pallas_src>
import functools

import jax
import jax.numpy as jnp
from jax import lax
from jax.experimental import pallas as pl
from jax.experimental.pallas import tpu as pltpu


def _round_up(v, m):
    return ((v + m - 1) // m) * m


# --------------------------------------------------------------------------
# Pallas kernel: paired-corner gather + bilinear combine of pre-projected maps
# --------------------------------------------------------------------------
def _point_head_kernel(idx_ref, wts_ref,          # SMEM: (1, 4, TN) i32, (1, 8, TN) f32
                       cmap_ref, fmap_ref,        # VMEM: (HWc, ncp), (HWf, ncp) f32
                       bias_ref,                  # VMEM: (1, ncp) f32
                       out_ref,                   # VMEM: (TN, ncp) f32
                       *, tile_n, unroll):
    bias = bias_ref[...]                          # hoisted (1, ncp)

    def body(n, carry):
        # Two x-adjacent corners share one dynamic (2, ncp) row-pair load.
        ct = cmap_ref[pl.ds(idx_ref[0, 0, n], 2), :]      # coarse, top row pair
        cb = cmap_ref[pl.ds(idx_ref[0, 1, n], 2), :]      # coarse, bottom row pair
        ft = fmap_ref[pl.ds(idx_ref[0, 2, n], 2), :]      # fine, top row pair
        fb = fmap_ref[pl.ds(idx_ref[0, 3, n], 2), :]      # fine, bottom row pair
        acc = (wts_ref[0, 0, n] * ct[0:1, :] + wts_ref[0, 1, n] * ct[1:2, :]
               + wts_ref[0, 2, n] * cb[0:1, :] + wts_ref[0, 3, n] * cb[1:2, :]
               + wts_ref[0, 4, n] * ft[0:1, :] + wts_ref[0, 5, n] * ft[1:2, :]
               + wts_ref[0, 6, n] * fb[0:1, :] + wts_ref[0, 7, n] * fb[1:2, :])
        out_ref[pl.ds(n, 1), :] = acc + bias
        return carry

    lax.fori_loop(0, tile_n, body, 0, unroll=unroll)


def point_head_pallas(idx, wts, proj_c, proj_f, bias):
    """idx:(B,4,N) i32  wts:(B,8,N) f32  proj_c:(B,HWc,ncp) f32
       proj_f:(B,HWf,ncp) f32  bias:(1,ncp) f32  ->  (B, n_pad, ncp) f32"""
    B, HWc, ncp = proj_c.shape
    _, HWf, _ = proj_f.shape
    n_pts = idx.shape[-1]

    # Point tiling: one tile for small N (rounded to a sublane multiple),
    # 128-point tiles for large N (adds a second parallel grid axis for v7x).
    if n_pts <= 128:
        tn = _round_up(n_pts, 8)
    else:
        tn = 128
    n_pad = _round_up(n_pts, tn)
    n_tiles = n_pad // tn

    pad_n = n_pad - n_pts
    if pad_n:
        # Padded points: index 0 (in-bounds), weight 0 -> row == bias, sliced off later.
        idx = jnp.pad(idx, ((0, 0), (0, 0), (0, pad_n)))
        wts = jnp.pad(wts, ((0, 0), (0, 0), (0, pad_n)))

    kernel = functools.partial(_point_head_kernel, tile_n=tn, unroll=min(8, tn))

    cost = pl.CostEstimate(
        flops=2 * B * n_pad * 8 * ncp,
        transcendentals=0,
        bytes_accessed=4 * (proj_c.size + proj_f.size + wts.size + bias.size
                            + idx.size + B * n_pad * ncp),
    )

    # Per-step VMEM: double-buffered feature maps + output tile + bias.
    vmem_bytes = 4 * (2 * (HWc + HWf) * ncp + 2 * tn * ncp + 2 * ncp) + (1 << 20)
    vmem_limit = int(min(max(vmem_bytes, 32 * 1024 * 1024), 128 * 1024 * 1024))

    out = pl.pallas_call(
        kernel,
        out_shape=jax.ShapeDtypeStruct((B, n_pad, ncp), jnp.float32),
        grid=(B, n_tiles),
        in_specs=[
            pl.BlockSpec((1, 4, tn), lambda b, t: (b, 0, t),
                         memory_space=pltpu.MemorySpace.SMEM),
            pl.BlockSpec((1, 8, tn), lambda b, t: (b, 0, t),
                         memory_space=pltpu.MemorySpace.SMEM),
            pl.BlockSpec((None, HWc, ncp), lambda b, t: (b, 0, 0)),
            pl.BlockSpec((None, HWf, ncp), lambda b, t: (b, 0, 0)),
            pl.BlockSpec((1, ncp), lambda b, t: (0, 0)),
        ],
        out_specs=pl.BlockSpec((None, tn, ncp), lambda b, t: (b, t, 0)),
        compiler_params=pltpu.CompilerParams(
            dimension_semantics=("parallel", "parallel"),
            vmem_limit_bytes=vmem_limit),
        cost_estimate=cost,
    )(idx, wts, proj_c, proj_f, bias)
    return out


# --------------------------------------------------------------------------
# JAX glue: paired-corner indices / weights.  Matches F.grid_sample with
# grid = 2*coords - 1, align_corners=False, mode='bilinear', padding_mode=
# 'zeros'.  Per point it returns the flat start index of the top and bottom
# x-adjacent row pairs (start and start+1 always in bounds) and the 4 weights
# applied to slots [top0, top1, bot0, bot1] (zero for out-of-bounds corners).
# --------------------------------------------------------------------------
def pair_indices_weights(coords, H, W):
    px = coords[..., 0] * W - 0.5                 # (B, N)
    py = coords[..., 1] * H - 0.5
    x0 = jnp.floor(px)
    y0 = jnp.floor(py)
    fx = px - x0
    fy = py - y0
    x0i = x0.astype(jnp.int32)
    y0i = y0.astype(jnp.int32)
    x1i = x0i + 1
    y1i = y0i + 1

    ax0 = (1.0 - fx) * ((x0i >= 0) & (x0i < W)).astype(jnp.float32)
    ax1 = fx * ((x1i >= 0) & (x1i < W)).astype(jnp.float32)
    by0 = (1.0 - fy) * ((y0i >= 0) & (y0i < H)).astype(jnp.float32)
    by1 = fy * ((y1i >= 0) & (y1i < H)).astype(jnp.float32)

    xs = jnp.clip(x0i, 0, W - 2)                  # pair columns (xs, xs+1), in bounds
    u0 = (jnp.where(xs == x0i, ax0, 0.0) + jnp.where(xs == x1i, ax1, 0.0))
    u1 = (jnp.where(xs + 1 == x0i, ax0, 0.0) + jnp.where(xs + 1 == x1i, ax1, 0.0))

    yt = jnp.clip(y0i, 0, H - 1)
    yb = jnp.clip(y1i, 0, H - 1)

    starts = jnp.stack([yt * W + xs, yb * W + xs], axis=1).astype(jnp.int32)  # (B,2,N)
    wts = jnp.stack([by0 * u0, by0 * u1, by1 * u0, by1 * u1], axis=1)         # (B,4,N)
    return starts, wts.astype(jnp.float32)


def point_sample_jax(inp, coords):
    """Gather-based point_sample (plain JAX) used inside sampling_points."""
    B, C, H, W = inp.shape
    starts, wts = pair_indices_weights(coords, H, W)          # (B,2,N), (B,4,N)
    flat = inp.reshape(B, C, H * W)

    def one(fb, sb, wb):                                      # (C,HW), (2,N), (4,N)
        gt0 = jnp.take(fb, sb[0], axis=1)
        gt1 = jnp.take(fb, sb[0] + 1, axis=1)
        gb0 = jnp.take(fb, sb[1], axis=1)
        gb1 = jnp.take(fb, sb[1] + 1, axis=1)
        return wb[0] * gt0 + wb[1] * gt1 + wb[2] * gb0 + wb[3] * gb1

    return jax.vmap(one)(flat, starts, wts)


def sampling_points(rng, mask, N, k, beta):
    """Training-mode sampling_points: importance (top beta*N uncertainty among
       k*N random points) + random coverage points. Returns (B, N, 2)."""
    B = mask.shape[0]
    mask_sorted = jnp.flip(jnp.sort(mask, axis=1), axis=1)    # descending over C
    kN = k * N
    n_imp = int(beta * N)
    k1, k2 = jax.random.split(rng)
    over_gen = jax.random.uniform(k1, (B, kN, 2), jnp.float32)            # [0,1)
    over_map = point_sample_jax(mask_sorted, over_gen)                    # (B,C,kN)
    uncertainty = -(over_map[:, 0] - over_map[:, 1])                      # (B,kN)
    _, idx = jax.lax.top_k(uncertainty, n_imp)                            # (B,n_imp)
    importance = jnp.take_along_axis(over_gen, idx[:, :, None], axis=1)   # (B,n_imp,2)
    coverage = jax.random.uniform(k2, (B, N - n_imp, 2), jnp.float32)
    return jnp.concatenate([importance, coverage], axis=1)                # (B,N,2)


# --------------------------------------------------------------------------
# pointHead.forward
# --------------------------------------------------------------------------
def point_head_forward(x, res2, out, mlp_weight, mlp_bias, *, k=3, beta=0.75,
                       rng=None):
    """x:(B,Cx,Hx,Wx) res2:(B,Cf,Hf,Wf) out:(B,Cc,Hc,Wc)
       mlp_weight:(num_classes, Cc+Cf, 1) mlp_bias:(num_classes,)"""
    if rng is None:
        rng = jax.random.PRNGKey(0)
    N = x.shape[-1] // 16
    points = sampling_points(rng, out, N, k, beta)            # (B, N, 2)

    B, Cc, Hc, Wc = out.shape
    _, Cf, Hf, Wf = res2.shape
    nc = mlp_weight.shape[0]
    ncp = _round_up(nc, 128)

    # Pre-project each feature map with its slice of the mlp weight (the 1x1
    # conv commutes with bilinear interpolation).  The einsum also produces the
    # (HW, ncp) layout directly -- no separate transpose pass.
    w2 = mlp_weight[..., 0].astype(jnp.float32)               # (nc, Cc+Cf)
    w_c = jnp.pad(w2[:, :Cc], ((0, ncp - nc), (0, 0)))
    w_f = jnp.pad(w2[:, Cc:], ((0, ncp - nc), (0, 0)))
    proj_c = jnp.einsum('bchw,oc->bhwo', out.astype(jnp.float32),
                        w_c).reshape(B, Hc * Wc, ncp)
    proj_f = jnp.einsum('bchw,oc->bhwo', res2.astype(jnp.float32),
                        w_f).reshape(B, Hf * Wf, ncp)
    bias = jnp.pad(mlp_bias.astype(jnp.float32), (0, ncp - nc)).reshape(1, ncp)

    # Paired-corner tables for both maps.
    sc, wc_ = pair_indices_weights(points, Hc, Wc)            # (B,2,N), (B,4,N)
    sf, wf_ = pair_indices_weights(points, Hf, Wf)
    idx = jnp.concatenate([sc, sf], axis=1)                   # (B,4,N)
    wts = jnp.concatenate([wc_, wf_], axis=1)                 # (B,8,N)

    rend_t = point_head_pallas(idx, wts, proj_c, proj_f, bias)   # (B, n_pad, ncp)
    rend = jnp.transpose(rend_t[:, :N, :nc], (0, 2, 1))          # (B, nc, N)
    return rend, points


# --------------------------------------------------------------------------
# Pure-JAX reference (independent 4-corner grid_sample) for a sanity check.
# --------------------------------------------------------------------------
def _point_sample_ref(inp, coords):
    B, C, H, W = inp.shape
    px = coords[..., 0] * W - 0.5
    py = coords[..., 1] * H - 0.5
    x0 = jnp.floor(px).astype(jnp.int32)
    y0 = jnp.floor(py).astype(jnp.int32)
    fx = px - x0
    fy = py - y0
    flat = inp.reshape(B, C, H * W)
    res = jnp.zeros((B, C, coords.shape[1]), jnp.float32)
    for dx, dy, w in ((0, 0, (1 - fx) * (1 - fy)), (1, 0, fx * (1 - fy)),
                      (0, 1, (1 - fx) * fy), (1, 1, fx * fy)):
        xi = x0 + dx
        yi = y0 + dy
        valid = ((xi >= 0) & (xi < W) & (yi >= 0) & (yi < H)).astype(jnp.float32)
        fidx = jnp.clip(yi, 0, H - 1) * W + jnp.clip(xi, 0, W - 1)
        g = jax.vmap(lambda f, i: jnp.take(f, i, axis=1))(flat, fidx)
        res = res + g * (w * valid)[:, None, :]
    return res


# --------------------------------------------------------------------------
if __name__ == "__main__":
    key = jax.random.PRNGKey(0)
    kx, kout, kres, kw, kb, ksamp = jax.random.split(key, 6)

    B = 2
    Cc, Cf = 4, 8                 # coarse (out) / fine (res2) channels
    in_c = Cc + Cf                # 12
    num_classes = 128             # module default -> lane-dense projected maps
    k_pts, beta = 3, 0.75

    # x only contributes its last spatial dim: N = 128 // 16 = 8 sample points
    x = jax.random.normal(kx, (B, 4, 16, 128), jnp.float32)
    out = jax.random.normal(kout, (B, Cc, 8, 16), jnp.float32)     # coarse pred
    res2 = jax.random.normal(kres, (B, Cf, 16, 32), jnp.float32)   # fine feats

    # Deterministic synthetic Conv1d(in_c, num_classes, 1) parameters
    mlp_weight = 0.1 * jax.random.normal(kw, (num_classes, in_c, 1), jnp.float32)
    mlp_bias = 0.1 * jax.random.normal(kb, (num_classes,), jnp.float32)

    rend, points = point_head_forward(x, res2, out, mlp_weight, mlp_bias,
                                      k=k_pts, beta=beta, rng=ksamp)
    jax.block_until_ready((rend, points))

    assert rend.shape == (B, num_classes, x.shape[-1] // 16)
    assert points.shape == (B, x.shape[-1] // 16, 2)

    # Numerical check vs. an independent pure-JAX reference of the forward.
    coarse_ref = _point_sample_ref(out, points)
    fine_ref = _point_sample_ref(res2, points)
    feat_ref = jnp.concatenate([coarse_ref, fine_ref], axis=1)        # (B, in_c, N)
    rend_ref = (jnp.einsum('oc,bcn->bon', mlp_weight[..., 0], feat_ref)
                + mlp_bias[None, :, None])
    max_err = float(jnp.max(jnp.abs(rend - rend_ref)))
    assert max_err < 1e-3, f"max abs error {max_err}"

    print("KERNEL_OK")
</pallas_src>

<mosaic_0001>
module attributes {stable_mosaic.version = 11 : i64} {
  func.func @_point_head_kernel(%arg0: i32, %arg1: i32, %arg2: memref<1x4x8xi32, #tpu.memory_space<smem>>, %arg3: memref<1x8x8xf32, #tpu.memory_space<smem>>, %arg4: memref<1x128x128xf32, #tpu.memory_space<vmem>>, %arg5: memref<1x512x128xf32, #tpu.memory_space<vmem>>, %arg6: memref<1x128xf32, #tpu.memory_space<vmem>>, %arg7: memref<1x8x128xf32, #tpu.memory_space<vmem>>) attributes {dimension_semantics = [#tpu.dimension_semantics<parallel>, #tpu.dimension_semantics<parallel>], iteration_bounds = array<i64: 2, 1>, scalar_prefetch = 0 : i64, scratch_operands = 0 : i64, tpu.core_type = #tpu.core_type<tc>, window_params = [{transform_indices = @transform_0, window_bounds = array<i64: 1, 4, 8>}, {transform_indices = @transform_1, window_bounds = array<i64: 1, 8, 8>}, {transform_indices = @transform_2, window_bounds = array<i64: 1, 128, 128>}, {transform_indices = @transform_3, window_bounds = array<i64: 1, 512, 128>}, {pipeline_mode = #tpu.pipeline_mode<synchronous>, transform_indices = @transform_4, window_bounds = array<i64: 1, 128>}, {transform_indices = @transform_5, window_bounds = array<i64: 1, 8, 128>}]} {
    %c0 = arith.constant 0 : index
    %c0_0 = arith.constant 0 : index
    %0 = vector.load %arg6[%c0, %c0_0] : memref<1x128xf32, #tpu.memory_space<vmem>>, vector<1x128xf32>
    %c0_i32 = arith.constant 0 : i32
    %c0_1 = arith.constant 0 : index
    %c0_2 = arith.constant 0 : index
    %1 = arith.index_cast %c0_i32 : i32 to index
    %2 = memref.load %arg2[%c0_1, %c0_2, %1] : memref<1x4x8xi32, #tpu.memory_space<smem>>
    %c0_3 = arith.constant 0 : index
    %3 = arith.index_cast %2 : i32 to index
    %c0_4 = arith.constant 0 : index
    %4 = vector.load %arg4[%c0_3, %3, %c0_4] : memref<1x128x128xf32, #tpu.memory_space<vmem>>, vector<1x2x128xf32>
    %5 = vector.shape_cast %4 : vector<1x2x128xf32> to vector<2x128xf32>
    %c0_5 = arith.constant 0 : index
    %c1 = arith.constant 1 : index
    %6 = arith.index_cast %c0_i32 : i32 to index
    %7 = memref.load %arg2[%c0_5, %c1, %6] : memref<1x4x8xi32, #tpu.memory_space<smem>>
    %c0_6 = arith.constant 0 : index
    %8 = arith.index_cast %7 : i32 to index
    %c0_7 = arith.constant 0 : index
    %9 = vector.load %arg4[%c0_6, %8, %c0_7] : memref<1x128x128xf32, #tpu.memory_space<vmem>>, vector<1x2x128xf32>
    %10 = vector.shape_cast %9 : vector<1x2x128xf32> to vector<2x128xf32>
    %c0_8 = arith.constant 0 : index
    %c2 = arith.constant 2 : index
    %11 = arith.index_cast %c0_i32 : i32 to index
    %12 = memref.load %arg2[%c0_8, %c2, %11] : memref<1x4x8xi32, #tpu.memory_space<smem>>
    %c0_9 = arith.constant 0 : index
    %13 = arith.index_cast %12 : i32 to index
    %c0_10 = arith.constant 0 : index
    %14 = vector.load %arg5[%c0_9, %13, %c0_10] : memref<1x512x128xf32, #tpu.memory_space<vmem>>, vector<1x2x128xf32>
    %15 = vector.shape_cast %14 : vector<1x2x128xf32> to vector<2x128xf32>
    %c0_11 = arith.constant 0 : index
    %c3 = arith.constant 3 : index
    %16 = arith.index_cast %c0_i32 : i32 to index
    %17 = memref.load %arg2[%c0_11, %c3, %16] : memref<1x4x8xi32, #tpu.memory_space<smem>>
    %c0_12 = arith.constant 0 : index
    %18 = arith.index_cast %17 : i32 to index
    %c0_13 = arith.constant 0 : index
    %19 = vector.load %arg5[%c0_12, %18, %c0_13] : memref<1x512x128xf32, #tpu.memory_space<vmem>>, vector<1x2x128xf32>
    %20 = vector.shape_cast %19 : vector<1x2x128xf32> to vector<2x128xf32>
    %c0_14 = arith.constant 0 : index
    %c0_15 = arith.constant 0 : index
    %21 = arith.index_cast %c0_i32 : i32 to index
    %22 = memref.load %arg3[%c0_14, %c0_15, %21] : memref<1x8x8xf32, #tpu.memory_space<smem>>
    %23 = vector.extract_strided_slice %5 {offsets = [0, 0], sizes = [1, 128], strides = [1, 1]} : vector<2x128xf32> to vector<1x128xf32>
    %24 = vector.broadcast %22 : f32 to vector<1x128xf32>
    %25 = arith.mulf %24, %23 : vector<1x128xf32>
    %c0_16 = arith.constant 0 : index
    %c1_17 = arith.constant 1 : index
    %26 = arith.index_cast %c0_i32 : i32 to index
    %27 = memref.load %arg3[%c0_16, %c1_17, %26] : memref<1x8x8xf32, #tpu.memory_space<smem>>
    %28 = vector.extract_strided_slice %5 {offsets = [1, 0], sizes = [1, 128], strides = [1, 1]} : vector<2x128xf32> to vector<1x128xf32>
    %29 = vector.broadcast %27 : f32 to vector<1x128xf32>
    %30 = arith.mulf %29, %28 : vector<1x128xf32>
    %31 = arith.addf %25, %30 : vector<1x128xf32>
    %c0_18 = arith.constant 0 : index
    %c2_19 = arith.constant 2 : index
    %32 = arith.index_cast %c0_i32 : i32 to index
    %33 = memref.load %arg3[%c0_18, %c2_19, %32] : memref<1x8x8xf32, #tpu.memory_space<smem>>
    %34 = vector.extract_strided_slice %10 {offsets = [0, 0], sizes = [1, 128], strides = [1, 1]} : vector<2x128xf32> to vector<1x128xf32>
    %35 = vector.broadcast %33 : f32 to vector<1x128xf32>
    %36 = arith.mulf %35, %34 : vector<1x128xf32>
    %37 = arith.addf %31, %36 : vector<1x128xf32>
    %c0_20 = arith.constant 0 : index
    %c3_21 = arith.constant 3 : index
    %38 = arith.index_cast %c0_i32 : i32 to index
    %39 = memref.load %arg3[%c0_20, %c3_21, %38] : memref<1x8x8xf32, #tpu.memory_space<smem>>
    %40 = vector.extract_strided_slice %10 {offsets = [1, 0], sizes = [1, 128], strides = [1, 1]} : vector<2x128xf32> to vector<1x128xf32>
    %41 = vector.broadcast %39 : f32 to vector<1x128xf32>
    %42 = arith.mulf %41, %40 : vector<1x128xf32>
    %43 = arith.addf %37, %42 : vector<1x128xf32>
    %c0_22 = arith.constant 0 : index
    %c4 = arith.constant 4 : index
    %44 = arith.index_cast %c0_i32 : i32 to index
    %45 = memref.load %arg3[%c0_22, %c4, %44] : memref<1x8x8xf32, #tpu.memory_space<smem>>
    %46 = vector.extract_strided_slice %15 {offsets = [0, 0], sizes = [1, 128], strides = [1, 1]} : vector<2x128xf32> to vector<1x128xf32>
    %47 = vector.broadcast %45 : f32 to vector<1x128xf32>
    %48 = arith.mulf %47, %46 : vector<1x128xf32>
    %49 = arith.addf %43, %48 : vector<1x128xf32>
    %c0_23 = arith.constant 0 : index
    %c5 = arith.constant 5 : index
    %50 = arith.index_cast %c0_i32 : i32 to index
    %51 = memref.load %arg3[%c0_23, %c5, %50] : memref<1x8x8xf32, #tpu.memory_space<smem>>
    %52 = vector.extract_strided_slice %15 {offsets = [1, 0], sizes = [1, 128], strides = [1, 1]} : vector<2x128xf32> to vector<1x128xf32>
    %53 = vector.broadcast %51 : f32 to vector<1x128xf32>
    %54 = arith.mulf %53, %52 : vector<1x128xf32>
    %55 = arith.addf %49, %54 : vector<1x128xf32>
    %c0_24 = arith.constant 0 : index
    %c6 = arith.constant 6 : index
    %56 = arith.index_cast %c0_i32 : i32 to index
    %57 = memref.load %arg3[%c0_24, %c6, %56] : memref<1x8x8xf32, #tpu.memory_space<smem>>
    %58 = vector.extract_strided_slice %20 {offsets = [0, 0], sizes = [1, 128], strides = [1, 1]} : vector<2x128xf32> to vector<1x128xf32>
    %59 = vector.broadcast %57 : f32 to vector<1x128xf32>
    %60 = arith.mulf %59, %58 : vector<1x128xf32>
    %61 = arith.addf %55, %60 : vector<1x128xf32>
    %c0_25 = arith.constant 0 : index
    %c7 = arith.constant 7 : index
    %62 = arith.index_cast %c0_i32 : i32 to index
    %63 = memref.load %arg3[%c0_25, %c7, %62] : memref<1x8x8xf32, #tpu.memory_space<smem>>
    %64 = vector.extract_strided_slice %20 {offsets = [1, 0], sizes = [1, 128], strides = [1, 1]} : vector<2x128xf32> to vector<1x128xf32>
    %65 = vector.broadcast %63 : f32 to vector<1x128xf32>
    %66 = arith.mulf %65, %64 : vector<1x128xf32>
    %67 = arith.addf %61, %66 : vector<1x128xf32>
    %68 = arith.addf %67, %0 : vector<1x128xf32>
    %c0_26 = arith.constant 0 : index
    %69 = arith.index_cast %c0_i32 : i32 to index
    %c0_27 = arith.constant 0 : index
    %70 = vector.load %arg7[%c0_26, %69, %c0_27] : memref<1x8x128xf32, #tpu.memory_space<vmem>>, vector<1x1x128xf32>
    %71 = vector.shape_cast %70 : vector<1x1x128xf32> to vector<1x128xf32>
    %72 = vector.shape_cast %68 : vector<1x128xf32> to vector<1x1x128xf32>
    tpu.vector_store %arg7[%c0_26, %69, %c0_27], %72 {strides = array<i32>} : memref<1x8x128xf32, #tpu.memory_space<vmem>>, vector<1x1x128xf32>,
    %c1_i32 = arith.constant 1 : i32
    %c0_28 = arith.constant 0 : index
    %c0_29 = arith.constant 0 : index
    %73 = arith.index_cast %c1_i32 : i32 to index
    %74 = memref.load %arg2[%c0_28, %c0_29, %73] : memref<1x4x8xi32, #tpu.memory_space<smem>>
    %c0_30 = arith.constant 0 : index
    %75 = arith.index_cast %74 : i32 to index
    %c0_31 = arith.constant 0 : index
    %76 = vector.load %arg4[%c0_30, %75, %c0_31] : memref<1x128x128xf32, #tpu.memory_space<vmem>>, vector<1x2x128xf32>
    %77 = vector.shape_cast %76 : vector<1x2x128xf32> to vector<2x128xf32>
    %c0_32 = arith.constant 0 : index
    %c1_33 = arith.constant 1 : index
    %78 = arith.index_cast %c1_i32 : i32 to index
    %79 = memref.load %arg2[%c0_32, %c1_33, %78] : memref<1x4x8xi32, #tpu.memory_space<smem>>
    %c0_34 = arith.constant 0 : index
    %80 = arith.index_cast %79 : i32 to index
    %c0_35 = arith.constant 0 : index
    %81 = vector.load %arg4[%c0_34, %80, %c0_35] : memref<1x128x128xf32, #tpu.memory_space<vmem>>, vector<1x2x128xf32>
    %82 = vector.shape_cast %81 : vector<1x2x128xf32> to vector<2x128xf32>
    %c0_36 = arith.constant 0 : index
    %c2_37 = arith.constant 2 : index
    %83 = arith.index_cast %c1_i32 : i32 to index
    %84 = memref.load %arg2[%c0_36, %c2_37, %83] : memref<1x4x8xi32, #tpu.memory_space<smem>>
    %c0_38 = arith.constant 0 : index
    %85 = arith.index_cast %84 : i32 to index
    %c0_39 = arith.constant 0 : index
    %86 = vector.load %arg5[%c0_38, %85, %c0_39] : memref<1x512x128xf32, #tpu.memory_space<vmem>>, vector<1x2x128xf32>
    %87 = vector.shape_cast %86 : vector<1x2x128xf32> to vector<2x128xf32>
    %c0_40 = arith.constant 0 : index
    %c3_41 = arith.constant 3 : index
    %88 = arith.index_cast %c1_i32 : i32 to index
    %89 = memref.load %arg2[%c0_40, %c3_41, %88] : memref<1x4x8xi32, #tpu.memory_space<smem>>
    %c0_42 = arith.constant 0 : index
    %90 = arith.index_cast %89 : i32 to index
    %c0_43 = arith.constant 0 : index
    %91 = vector.load %arg5[%c0_42, %90, %c0_43] : memref<1x512x128xf32, #tpu.memory_space<vmem>>, vector<1x2x128xf32>
    %92 = vector.shape_cast %91 : vector<1x2x128xf32> to vector<2x128xf32>
    %c0_44 = arith.constant 0 : index
    %c0_45 = arith.constant 0 : index
    %93 = arith.index_cast %c1_i32 : i32 to index
    %94 = memref.load %arg3[%c0_44, %c0_45, %93] : memref<1x8x8xf32, #tpu.memory_space<smem>>
    %95 = vector.extract_strided_slice %77 {offsets = [0, 0], sizes = [1, 128], strides = [1, 1]} : vector<2x128xf32> to vector<1x128xf32>
    %96 = vector.broadcast %94 : f32 to vector<1x128xf32>
    %97 = arith.mulf %96, %95 : vector<1x128xf32>
    %c0_46 = arith.constant 0 : index
    %c1_47 = arith.constant 1 : index
    %98 = arith.index_cast %c1_i32 : i32 to index
    %99 = memref.load %arg3[%c0_46, %c1_47, %98] : memref<1x8x8xf32, #tpu.memory_space<smem>>
    %100 = vector.extract_strided_slice %77 {offsets = [1, 0], sizes = [1, 128], strides = [1, 1]} : vector<2x128xf32> to vector<1x128xf32>
    %101 = vector.broadcast %99 : f32 to vector<1x128xf32>
    %102 = arith.mulf %101, %100 : vector<1x128xf32>
    %103 = arith.addf %97, %102 : vector<1x128xf32>
    %c0_48 = arith.constant 0 : index
    %c2_49 = arith.constant 2 : index
    %104 = arith.index_cast %c1_i32 : i32 to index
    %105 = memref.load %arg3[%c0_48, %c2_49, %104] : memref<1x8x8xf32, #tpu.memory_space<smem>>
    %106 = vector.extract_strided_slice %82 {offsets = [0, 0], sizes = [1, 128], strides = [1, 1]} : vector<2x128xf32> to vector<1x128xf32>
    %107 = vector.broadcast %105 : f32 to vector<1x128xf32>
    %108 = arith.mulf %107, %106 : vector<1x128xf32>
    %109 = arith.addf %103, %108 : vector<1x128xf32>
    %c0_50 = arith.constant 0 : index
    %c3_51 = arith.constant 3 : index
    %110 = arith.index_cast %c1_i32 : i32 to index
    %111 = memref.load %arg3[%c0_50, %c3_51, %110] : memref<1x8x8xf32, #tpu.memory_space<smem>>
    %112 = vector.extract_strided_slice %82 {offsets = [1, 0], sizes = [1, 128], strides = [1, 1]} : vector<2x128xf32> to vector<1x128xf32>
    %113 = vector.broadcast %111 : f32 to vector<1x128xf32>
    %114 = arith.mulf %113, %112 : vector<1x128xf32>
    %115 = arith.addf %109, %114 : vector<1x128xf32>
    %c0_52 = arith.constant 0 : index
    %c4_53 = arith.constant 4 : index
    %116 = arith.index_cast %c1_i32 : i32 to index
    %117 = memref.load %arg3[%c0_52, %c4_53, %116] : memref<1x8x8xf32, #tpu.memory_space<smem>>
    %118 = vector.extract_strided_slice %87 {offsets = [0, 0], sizes = [1, 128], strides = [1, 1]} : vector<2x128xf32> to vector<1x128xf32>
    %119 = vector.broadcast %117 : f32 to vector<1x128xf32>
    %120 = arith.mulf %119, %118 : vector<1x128xf32>
    %121 = arith.addf %115, %120 : vector<1x128xf32>
    %c0_54 = arith.constant 0 : index
    %c5_55 = arith.constant 5 : index
    %122 = arith.index_cast %c1_i32 : i32 to index
    %123 = memref.load %arg3[%c0_54, %c5_55, %122] : memref<1x8x8xf32, #tpu.memory_space<smem>>
    %124 = vector.extract_strided_slice %87 {offsets = [1, 0], sizes = [1, 128], strides = [1, 1]} : vector<2x128xf32> to vector<1x128xf32>
    %125 = vector.broadcast %123 : f32 to vector<1x128xf32>
    %126 = arith.mulf %125, %124 : vector<1x128xf32>
    %127 = arith.addf %121, %126 : vector<1x128xf32>
    %c0_56 = arith.constant 0 : index
    %c6_57 = arith.constant 6 : index
    %128 = arith.index_cast %c1_i32 : i32 to index
    %129 = memref.load %arg3[%c0_56, %c6_57, %128] : memref<1x8x8xf32, #tpu.memory_space<smem>>
    %130 = vector.extract_strided_slice %92 {offsets = [0, 0], sizes = [1, 128], strides = [1, 1]} : vector<2x128xf32> to vector<1x128xf32>
    %131 = vector.broadcast %129 : f32 to vector<1x128xf32>
    %132 = arith.mulf %131, %130 : vector<1x128xf32>
    %133 = arith.addf %127, %132 : vector<1x128xf32>
    %c0_58 = arith.constant 0 : index
    %c7_59 = arith.constant 7 : index
    %134 = arith.index_cast %c1_i32 : i32 to index
    %135 = memref.load %arg3[%c0_58, %c7_59, %134] : memref<1x8x8xf32, #tpu.memory_space<smem>>
    %136 = vector.extract_strided_slice %92 {offsets = [1, 0], sizes = [1, 128], strides = [1, 1]} : vector<2x128xf32> to vector<1x128xf32>
    %137 = vector.broadcast %135 : f32 to vector<1x128xf32>
    %138 = arith.mulf %137, %136 : vector<1x128xf32>
    %139 = arith.addf %133, %138 : vector<1x128xf32>
    %140 = arith.addf %139, %0 : vector<1x128xf32>
    %c0_60 = arith.constant 0 : index
    %141 = arith.index_cast %c1_i32 : i32 to index
    %c0_61 = arith.constant 0 : index
    %142 = vector.load %arg7[%c0_60, %141, %c0_61] : memref<1x8x128xf32, #tpu.memory_space<vmem>>, vector<1x1x128xf32>
    %143 = vector.shape_cast %142 : vector<1x1x128xf32> to vector<1x128xf32>
    %144 = vector.shape_cast %140 : vector<1x128xf32> to vector<1x1x128xf32>
    tpu.vector_store %arg7[%c0_60, %141, %c0_61], %144 {strides = array<i32>} : memref<1x8x128xf32, #tpu.memory_space<vmem>>, vector<1x1x128xf32>,
    %c2_i32 = arith.constant 2 : i32
    %c0_62 = arith.constant 0 : index
    %c0_63 = arith.constant 0 : index
    %145 = arith.index_cast %c2_i32 : i32 to index
    %146 = memref.load %arg2[%c0_62, %c0_63, %145] : memref<1x4x8xi32, #tpu.memory_space<smem>>
    %c0_64 = arith.constant 0 : index
    %147 = arith.index_cast %146 : i32 to index
    %c0_65 = arith.constant 0 : index
    %148 = vector.load %arg4[%c0_64, %147, %c0_65] : memref<1x128x128xf32, #tpu.memory_space<vmem>>, vector<1x2x128xf32>
    %149 = vector.shape_cast %148 : vector<1x2x128xf32> to vector<2x128xf32>
    %c0_66 = arith.constant 0 : index
    %c1_67 = arith.constant 1 : index
    %150 = arith.index_cast %c2_i32 : i32 to index
    %151 = memref.load %arg2[%c0_66, %c1_67, %150] : memref<1x4x8xi32, #tpu.memory_space<smem>>
    %c0_68 = arith.constant 0 : index
    %152 = arith.index_cast %151 : i32 to index
    %c0_69 = arith.constant 0 : index
    %153 = vector.load %arg4[%c0_68, %152, %c0_69] : memref<1x128x128xf32, #tpu.memory_space<vmem>>, vector<1x2x128xf32>
    %154 = vector.shape_cast %153 : vector<1x2x128xf32> to vector<2x128xf32>
    %c0_70 = arith.constant 0 : index
    %c2_71 = arith.constant 2 : index
    %155 = arith.index_cast %c2_i32 : i32 to index
    %156 = memref.load %arg2[%c0_70, %c2_71, %155] : memref<1x4x8xi32, #tpu.memory_space<smem>>
    %c0_72 = arith.constant 0 : index
    %157 = arith.index_cast %156 : i32 to index
    %c0_73 = arith.constant 0 : index
    %158 = vector.load %arg5[%c0_72, %157, %c0_73] : memref<1x512x128xf32, #tpu.memory_space<vmem>>, vector<1x2x128xf32>
    %159 = vector.shape_cast %158 : vector<1x2x128xf32> to vector<2x128xf32>
    %c0_74 = arith.constant 0 : index
    %c3_75 = arith.constant 3 : index
    %160 = arith.index_cast %c2_i32 : i32 to index
    %161 = memref.load %arg2[%c0_74, %c3_75, %160] : memref<1x4x8xi32, #tpu.memory_space<smem>>
    %c0_76 = arith.constant 0 : index
    %162 = arith.index_cast %161 : i32 to index
    %c0_77 = arith.constant 0 : index
    %163 = vector.load %arg5[%c0_76, %162, %c0_77] : memref<1x512x128xf32, #tpu.memory_space<vmem>>, vector<1x2x128xf32>
    %164 = vector.shape_cast %163 : vector<1x2x128xf32> to vector<2x128xf32>
    %c0_78 = arith.constant 0 : index
    %c0_79 = arith.constant 0 : index
    %165 = arith.index_cast %c2_i32 : i32 to index
    %166 = memref.load %arg3[%c0_78, %c0_79, %165] : memref<1x8x8xf32, #tpu.memory_space<smem>>
    %167 = vector.extract_strided_slice %149 {offsets = [0, 0], sizes = [1, 128], strides = [1, 1]} : vector<2x128xf32> to vector<1x128xf32>
    %168 = vector.broadcast %166 : f32 to vector<1x128xf32>
    %169 = arith.mulf %168, %167 : vector<1x128xf32>
    %c0_80 = arith.constant 0 : index
    %c1_81 = arith.constant 1 : index
    %170 = arith.index_cast %c2_i32 : i32 to index
    %171 = memref.load %arg3[%c0_80, %c1_81, %170] : memref<1x8x8xf32, #tpu.memory_space<smem>>
    %172 = vector.extract_strided_slice %149 {offsets = [1, 0], sizes = [1, 128], strides = [1, 1]} : vector<2x128xf32> to vector<1x128xf32>
    %173 = vector.broadcast %171 : f32 to vector<1x128xf32>
    %174 = arith.mulf %173, %172 : vector<1x128xf32>
    %175 = arith.addf %169, %174 : vector<1x128xf32>
    %c0_82 = arith.constant 0 : index
    %c2_83 = arith.constant 2 : index
    %176 = arith.index_cast %c2_i32 : i32 to index
    %177 = memref.load %arg3[%c0_82, %c2_83, %176] : memref<1x8x8xf32, #tpu.memory_space<smem>>
    %178 = vector.extract_strided_slice %154 {offsets = [0, 0], sizes = [1, 128], strides = [1, 1]} : vector<2x128xf32> to vector<1x128xf32>
    %179 = vector.broadcast %177 : f32 to vector<1x128xf32>
    %180 = arith.mulf %179, %178 : vector<1x128xf32>
    %181 = arith.addf %175, %180 : vector<1x128xf32>
    %c0_84 = arith.constant 0 : index
    %c3_85 = arith.constant 3 : index
    %182 = arith.index_cast %c2_i32 : i32 to index
    %183 = memref.load %arg3[%c0_84, %c3_85, %182] : memref<1x8x8xf32, #tpu.memory_space<smem>>
    %184 = vector.extract_strided_slice %154 {offsets = [1, 0], sizes = [1, 128], strides = [1, 1]} : vector<2x128xf32> to vector<1x128xf32>
    %185 = vector.broadcast %183 : f32 to vector<1x128xf32>
    %186 = arith.mulf %185, %184 : vector<1x128xf32>
    %187 = arith.addf %181, %186 : vector<1x128xf32>
    %c0_86 = arith.constant 0 : index
    %c4_87 = arith.constant 4 : index
    %188 = arith.index_cast %c2_i32 : i32 to index
    %189 = memref.load %arg3[%c0_86, %c4_87, %188] : memref<1x8x8xf32, #tpu.memory_space<smem>>
    %190 = vector.extract_strided_slice %159 {offsets = [0, 0], sizes = [1, 128], strides = [1, 1]} : vector<2x128xf32> to vector<1x128xf32>
    %191 = vector.broadcast %189 : f32 to vector<1x128xf32>
    %192 = arith.mulf %191, %190 : vector<1x128xf32>
    %193 = arith.addf %187, %192 : vector<1x128xf32>
    %c0_88 = arith.constant 0 : index
    %c5_89 = arith.constant 5 : index
    %194 = arith.index_cast %c2_i32 : i32 to index
    %195 = memref.load %arg3[%c0_88, %c5_89, %194] : memref<1x8x8xf32, #tpu.memory_space<smem>>
    %196 = vector.extract_strided_slice %159 {offsets = [1, 0], sizes = [1, 128], strides = [1, 1]} : vector<2x128xf32> to vector<1x128xf32>
    %197 = vector.broadcast %195 : f32 to vector<1x128xf32>
    %198 = arith.mulf %197, %196 : vector<1x128xf32>
    %199 = arith.addf %193, %198 : vector<1x128xf32>
    %c0_90 = arith.constant 0 : index
    %c6_91 = arith.constant 6 : index
    %200 = arith.index_cast %c2_i32 : i32 to index
    %201 = memref.load %arg3[%c0_90, %c6_91, %200] : memref<1x8x8xf32, #tpu.memory_space<smem>>
    %202 = vector.extract_strided_slice %164 {offsets = [0, 0], sizes = [1, 128], strides = [1, 1]} : vector<2x128xf32> to vector<1x128xf32>
    %203 = vector.broadcast %201 : f32 to vector<1x128xf32>
    %204 = arith.mulf %203, %202 : vector<1x128xf32>
    %205 = arith.addf %199, %204 : vector<1x128xf32>
    %c0_92 = arith.constant 0 : index
    %c7_93 = arith.constant 7 : index
    %206 = arith.index_cast %c2_i32 : i32 to index
    %207 = memref.load %arg3[%c0_92, %c7_93, %206] : memref<1x8x8xf32, #tpu.memory_space<smem>>
    %208 = vector.extract_strided_slice %164 {offsets = [1, 0], sizes = [1, 128], strides = [1, 1]} : vector<2x128xf32> to vector<1x128xf32>
    %209 = vector.broadcast %207 : f32 to vector<1x128xf32>
    %210 = arith.mulf %209, %208 : vector<1x128xf32>
    %211 = arith.addf %205, %210 : vector<1x128xf32>
    %212 = arith.addf %211, %0 : vector<1x128xf32>
    %c0_94 = arith.constant 0 : index
    %213 = arith.index_cast %c2_i32 : i32 to index
    %c0_95 = arith.constant 0 : index
    %214 = vector.load %arg7[%c0_94, %213, %c0_95] : memref<1x8x128xf32, #tpu.memory_space<vmem>>, vector<1x1x128xf32>
    %215 = vector.shape_cast %214 : vector<1x1x128xf32> to vector<1x128xf32>
    %216 = vector.shape_cast %212 : vector<1x128xf32> to vector<1x1x128xf32>
    tpu.vector_store %arg7[%c0_94, %213, %c0_95], %216 {strides = array<i32>} : memref<1x8x128xf32, #tpu.memory_space<vmem>>, vector<1x1x128xf32>,
    %c3_i32 = arith.constant 3 : i32
    %c0_96 = arith.constant 0 : index
    %c0_97 = arith.constant 0 : index
    %217 = arith.index_cast %c3_i32 : i32 to index
    %218 = memref.load %arg2[%c0_96, %c0_97, %217] : memref<1x4x8xi32, #tpu.memory_space<smem>>
    %c0_98 = arith.constant 0 : index
    %219 = arith.index_cast %218 : i32 to index
    %c0_99 = arith.constant 0 : index
    %220 = vector.load %arg4[%c0_98, %219, %c0_99] : memref<1x128x128xf32, #tpu.memory_space<vmem>>, vector<1x2x128xf32>
    %221 = vector.shape_cast %220 : vector<1x2x128xf32> to vector<2x128xf32>
    %c0_100 = arith.constant 0 : index
    %c1_101 = arith.constant 1 : index
    %222 = arith.index_cast %c3_i32 : i32 to index
    %223 = memref.load %arg2[%c0_100, %c1_101, %222] : memref<1x4x8xi32, #tpu.memory_space<smem>>
    %c0_102 = arith.constant 0 : index
    %224 = arith.index_cast %223 : i32 to index
    %c0_103 = arith.constant 0 : index
    %225 = vector.load %arg4[%c0_102, %224, %c0_103] : memref<1x128x128xf32, #tpu.memory_space<vmem>>, vector<1x2x128xf32>
    %226 = vector.shape_cast %225 : vector<1x2x128xf32> to vector<2x128xf32>
    %c0_104 = arith.constant 0 : index
    %c2_105 = arith.constant 2 : index
    %227 = arith.index_cast %c3_i32 : i32 to index
    %228 = memref.load %arg2[%c0_104, %c2_105, %227] : memref<1x4x8xi32, #tpu.memory_space<smem>>
    %c0_106 = arith.constant 0 : index
    %229 = arith.index_cast %228 : i32 to index
    %c0_107 = arith.constant 0 : index
    %230 = vector.load %arg5[%c0_106, %229, %c0_107] : memref<1x512x128xf32, #tpu.memory_space<vmem>>, vector<1x2x128xf32>
    %231 = vector.shape_cast %230 : vector<1x2x128xf32> to vector<2x128xf32>
    %c0_108 = arith.constant 0 : index
    %c3_109 = arith.constant 3 : index
    %232 = arith.index_cast %c3_i32 : i32 to index
    %233 = memref.load %arg2[%c0_108, %c3_109, %232] : memref<1x4x8xi32, #tpu.memory_space<smem>>
    %c0_110 = arith.constant 0 : index
    %234 = arith.index_cast %233 : i32 to index
    %c0_111 = arith.constant 0 : index
    %235 = vector.load %arg5[%c0_110, %234, %c0_111] : memref<1x512x128xf32, #tpu.memory_space<vmem>>, vector<1x2x128xf32>
    %236 = vector.shape_cast %235 : vector<1x2x128xf32> to vector<2x128xf32>
    %c0_112 = arith.constant 0 : index
    %c0_113 = arith.constant 0 : index
    %237 = arith.index_cast %c3_i32 : i32 to index
    %238 = memref.load %arg3[%c0_112, %c0_113, %237] : memref<1x8x8xf32, #tpu.memory_space<smem>>
    %239 = vector.extract_strided_slice %221 {offsets = [0, 0], sizes = [1, 128], strides = [1, 1]} : vector<2x128xf32> to vector<1x128xf32>
    %240 = vector.broadcast %238 : f32 to vector<1x128xf32>
    %241 = arith.mulf %240, %239 : vector<1x128xf32>
    %c0_114 = arith.constant 0 : index
    %c1_115 = arith.constant 1 : index
    %242 = arith.index_cast %c3_i32 : i32 to index
    %243 = memref.load %arg3[%c0_114, %c1_115, %242] : memref<1x8x8xf32, #tpu.memory_space<smem>>
    %244 = vector.extract_strided_slice %221 {offsets = [1, 0], sizes = [1, 128], strides = [1, 1]} : vector<2x128xf32> to vector<1x128xf32>
    %245 = vector.broadcast %243 : f32 to vector<1x128xf32>
    %246 = arith.mulf %245, %244 : vector<1x128xf32>
    %247 = arith.addf %241, %246 : vector<1x128xf32>
    %c0_116 = arith.constant 0 : index
    %c2_117 = arith.constant 2 : index
    %248 = arith.index_cast %c3_i32 : i32 to index
    %249 = memref.load %arg3[%c0_116, %c2_117, %248] : memref<1x8x8xf32, #tpu.memory_space<smem>>
    %250 = vector.extract_strided_slice %226 {offsets = [0, 0], sizes = [1, 128], strides = [1, 1]} : vector<2x128xf32> to vector<1x128xf32>
    %251 = vector.broadcast %249 : f32 to vector<1x128xf32>
    %252 = arith.mulf %251, %250 : vector<1x128xf32>
    %253 = arith.addf %247, %252 : vector<1x128xf32>
    %c0_118 = arith.constant 0 : index
    %c3_119 = arith.constant 3 : index
    %254 = arith.index_cast %c3_i32 : i32 to index
    %255 = memref.load %arg3[%c0_118, %c3_119, %254] : memref<1x8x8xf32, #tpu.memory_space<smem>>
    %256 = vector.extract_strided_slice %226 {offsets = [1, 0], sizes = [1, 128], strides = [1, 1]} : vector<2x128xf32> to vector<1x128xf32>
    %257 = vector.broadcast %255 : f32 to vector<1x128xf32>
    %258 = arith.mulf %257, %256 : vector<1x128xf32>
    %259 = arith.addf %253, %258 : vector<1x128xf32>
    %c0_120 = arith.constant 0 : index
    %c4_121 = arith.constant 4 : index
    %260 = arith.index_cast %c3_i32 : i32 to index
    %261 = memref.load %arg3[%c0_120, %c4_121, %260] : memref<1x8x8xf32, #tpu.memory_space<smem>>
    %262 = vector.extract_strided_slice %231 {offsets = [0, 0], sizes = [1, 128], strides = [1, 1]} : vector<2x128xf32> to vector<1x128xf32>
    %263 = vector.broadcast %261 : f32 to vector<1x128xf32>
    %264 = arith.mulf %263, %262 : vector<1x128xf32>
    %265 = arith.addf %259, %264 : vector<1x128xf32>
    %c0_122 = arith.constant 0 : index
    %c5_123 = arith.constant 5 : index
    %266 = arith.index_cast %c3_i32 : i32 to index
    %267 = memref.load %arg3[%c0_122, %c5_123, %266] : memref<1x8x8xf32, #tpu.memory_space<smem>>
    %268 = vector.extract_strided_slice %231 {offsets = [1, 0], sizes = [1, 128], strides = [1, 1]} : vector<2x128xf32> to vector<1x128xf32>
    %269 = vector.broadcast %267 : f32 to vector<1x128xf32>
    %270 = arith.mulf %269, %268 : vector<1x128xf32>
    %271 = arith.addf %265, %270 : vector<1x128xf32>
    %c0_124 = arith.constant 0 : index
    %c6_125 = arith.constant 6 : index
    %272 = arith.index_cast %c3_i32 : i32 to index
    %273 = memref.load %arg3[%c0_124, %c6_125, %272] : memref<1x8x8xf32, #tpu.memory_space<smem>>
    %274 = vector.extract_strided_slice %236 {offsets = [0, 0], sizes = [1, 128], strides = [1, 1]} : vector<2x128xf32> to vector<1x128xf32>
    %275 = vector.broadcast %273 : f32 to vector<1x128xf32>
    %276 = arith.mulf %275, %274 : vector<1x128xf32>
    %277 = arith.addf %271, %276 : vector<1x128xf32>
    %c0_126 = arith.constant 0 : index
    %c7_127 = arith.constant 7 : index
    %278 = arith.index_cast %c3_i32 : i32 to index
    %279 = memref.load %arg3[%c0_126, %c7_127, %278] : memref<1x8x8xf32, #tpu.memory_space<smem>>
    %280 = vector.extract_strided_slice %236 {offsets = [1, 0], sizes = [1, 128], strides = [1, 1]} : vector<2x128xf32> to vector<1x128xf32>
    %281 = vector.broadcast %279 : f32 to vector<1x128xf32>
    %282 = arith.mulf %281, %280 : vector<1x128xf32>
    %283 = arith.addf %277, %282 : vector<1x128xf32>
    %284 = arith.addf %283, %0 : vector<1x128xf32>
    %c0_128 = arith.constant 0 : index
    %285 = arith.index_cast %c3_i32 : i32 to index
    %c0_129 = arith.constant 0 : index
    %286 = vector.load %arg7[%c0_128, %285, %c0_129] : memref<1x8x128xf32, #tpu.memory_space<vmem>>, vector<1x1x128xf32>
    %287 = vector.shape_cast %286 : vector<1x1x128xf32> to vector<1x128xf32>
    %288 = vector.shape_cast %284 : vector<1x128xf32> to vector<1x1x128xf32>
    tpu.vector_store %arg7[%c0_128, %285, %c0_129], %288 {strides = array<i32>} : memref<1x8x128xf32, #tpu.memory_space<vmem>>, vector<1x1x128xf32>,
    %c4_i32 = arith.constant 4 : i32
    %c0_130 = arith.constant 0 : index
    %c0_131 = arith.constant 0 : index
    %289 = arith.index_cast %c4_i32 : i32 to index
    %290 = memref.load %arg2[%c0_130, %c0_131, %289] : memref<1x4x8xi32, #tpu.memory_space<smem>>
    %c0_132 = arith.constant 0 : index
    %291 = arith.index_cast %290 : i32 to index
    %c0_133 = arith.constant 0 : index
    %292 = vector.load %arg4[%c0_132, %291, %c0_133] : memref<1x128x128xf32, #tpu.memory_space<vmem>>, vector<1x2x128xf32>
    %293 = vector.shape_cast %292 : vector<1x2x128xf32> to vector<2x128xf32>
    %c0_134 = arith.constant 0 : index
    %c1_135 = arith.constant 1 : index
    %294 = arith.index_cast %c4_i32 : i32 to index
    %295 = memref.load %arg2[%c0_134, %c1_135, %294] : memref<1x4x8xi32, #tpu.memory_space<smem>>
    %c0_136 = arith.constant 0 : index
    %296 = arith.index_cast %295 : i32 to index
    %c0_137 = arith.constant 0 : index
    %297 = vector.load %arg4[%c0_136, %296, %c0_137] : memref<1x128x128xf32, #tpu.memory_space<vmem>>, vector<1x2x128xf32>
    %298 = vector.shape_cast %297 : vector<1x2x128xf32> to vector<2x128xf32>
    %c0_138 = arith.constant 0 : index
    %c2_139 = arith.constant 2 : index
    %299 = arith.index_cast %c4_i32 : i32 to index
    %300 = memref.load %arg2[%c0_138, %c2_139, %299] : memref<1x4x8xi32, #tpu.memory_space<smem>>
    %c0_140 = arith.constant 0 : index
    %301 = arith.index_cast %300 : i32 to index
    %c0_141 = arith.constant 0 : index
    %302 = vector.load %arg5[%c0_140, %301, %c0_141] : memref<1x512x128xf32, #tpu.memory_space<vmem>>, vector<1x2x128xf32>
    %303 = vector.shape_cast %302 : vector<1x2x128xf32> to vector<2x128xf32>
    %c0_142 = arith.constant 0 : index
    %c3_143 = arith.constant 3 : index
    %304 = arith.index_cast %c4_i32 : i32 to index
    %305 = memref.load %arg2[%c0_142, %c3_143, %304] : memref<1x4x8xi32, #tpu.memory_space<smem>>
    %c0_144 = arith.constant 0 : index
    %306 = arith.index_cast %305 : i32 to index
    %c0_145 = arith.constant 0 : index
    %307 = vector.load %arg5[%c0_144, %306, %c0_145] : memref<1x512x128xf32, #tpu.memory_space<vmem>>, vector<1x2x128xf32>
    %308 = vector.shape_cast %307 : vector<1x2x128xf32> to vector<2x128xf32>
    %c0_146 = arith.constant 0 : index
    %c0_147 = arith.constant 0 : index
    %309 = arith.index_cast %c4_i32 : i32 to index
    %310 = memref.load %arg3[%c0_146, %c0_147, %309] : memref<1x8x8xf32, #tpu.memory_space<smem>>
    %311 = vector.extract_strided_slice %293 {offsets = [0, 0], sizes = [1, 128], strides = [1, 1]} : vector<2x128xf32> to vector<1x128xf32>
    %312 = vector.broadcast %310 : f32 to vector<1x128xf32>
    %313 = arith.mulf %312, %311 : vector<1x128xf32>
    %c0_148 = arith.constant 0 : index
    %c1_149 = arith.constant 1 : index
    %314 = arith.index_cast %c4_i32 : i32 to index
    %315 = memref.load %arg3[%c0_148, %c1_149, %314] : memref<1x8x8xf32, #tpu.memory_space<smem>>
    %316 = vector.extract_strided_slice %293 {offsets = [1, 0], sizes = [1, 128], strides = [1, 1]} : vector<2x128xf32> to vector<1x128xf32>
    %317 = vector.broadcast %315 : f32 to vector<1x128xf32>
    %318 = arith.mulf %317, %316 : vector<1x128xf32>
    %319 = arith.addf %313, %318 : vector<1x128xf32>
    %c0_150 = arith.constant 0 : index
    %c2_151 = arith.constant 2 : index
    %320 = arith.index_cast %c4_i32 : i32 to index
    %321 = memref.load %arg3[%c0_150, %c2_151, %320] : memref<1x8x8xf32, #tpu.memory_space<smem>>
    %322 = vector.extract_strided_slice %298 {offsets = [0, 0], sizes = [1, 128], strides = [1, 1]} : vector<2x128xf32> to vector<1x128xf32>
    %323 = vector.broadcast %321 : f32 to vector<1x128xf32>
    %324 = arith.mulf %323, %322 : vector<1x128xf32>
    %325 = arith.addf %319, %324 : vector<1x128xf32>
    %c0_152 = arith.constant 0 : index
    %c3_153 = arith.constant 3 : index
    %326 = arith.index_cast %c4_i32 : i32 to index
    %327 = memref.load %arg3[%c0_152, %c3_153, %326] : memref<1x8x8xf32, #tpu.memory_space<smem>>
    %328 = vector.extract_strided_slice %298 {offsets = [1, 0], sizes = [1, 128], strides = [1, 1]} : vector<2x128xf32> to vector<1x128xf32>
    %329 = vector.broadcast %327 : f32 to vector<1x128xf32>
    %330 = arith.mulf %329, %328 : vector<1x128xf32>
    %331 = arith.addf %325, %330 : vector<1x128xf32>
    %c0_154 = arith.constant 0 : index
    %c4_155 = arith.constant 4 : index
    %332 = arith.index_cast %c4_i32 : i32 to index
    %333 = memref.load %arg3[%c0_154, %c4_155, %332] : memref<1x8x8xf32, #tpu.memory_space<smem>>
    %334 = vector.extract_strided_slice %303 {offsets = [0, 0], sizes = [1, 128], strides = [1, 1]} : vector<2x128xf32> to vector<1x128xf32>
    %335 = vector.broadcast %333 : f32 to vector<1x128xf32>
    %336 = arith.mulf %335, %334 : vector<1x128xf32>
    %337 = arith.addf %331, %336 : vector<1x128xf32>
    %c0_156 = arith.constant 0 : index
    %c5_157 = arith.constant 5 : index
    %338 = arith.index_cast %c4_i32 : i32 to index
    %339 = memref.load %arg3[%c0_156, %c5_157, %338] : memref<1x8x8xf32, #tpu.memory_space<smem>>
    %340 = vector.extract_strided_slice %303 {offsets = [1, 0], sizes = [1, 128], strides = [1, 1]} : vector<2x128xf32> to vector<1x128xf32>
    %341 = vector.broadcast %339 : f32 to vector<1x128xf32>
    %342 = arith.mulf %341, %340 : vector<1x128xf32>
    %343 = arith.addf %337, %342 : vector<1x128xf32>
    %c0_158 = arith.constant 0 : index
    %c6_159 = arith.constant 6 : index
    %344 = arith.index_cast %c4_i32 : i32 to index
    %345 = memref.load %arg3[%c0_158, %c6_159, %344] : memref<1x8x8xf32, #tpu.memory_space<smem>>
    %346 = vector.extract_strided_slice %308 {offsets = [0, 0], sizes = [1, 128], strides = [1, 1]} : vector<2x128xf32> to vector<1x128xf32>
    %347 = vector.broadcast %345 : f32 to vector<1x128xf32>
    %348 = arith.mulf %347, %346 : vector<1x128xf32>
    %349 = arith.addf %343, %348 : vector<1x128xf32>
    %c0_160 = arith.constant 0 : index
    %c7_161 = arith.constant 7 : index
    %350 = arith.index_cast %c4_i32 : i32 to index
    %351 = memref.load %arg3[%c0_160, %c7_161, %350] : memref<1x8x8xf32, #tpu.memory_space<smem>>
    %352 = vector.extract_strided_slice %308 {offsets = [1, 0], sizes = [1, 128], strides = [1, 1]} : vector<2x128xf32> to vector<1x128xf32>
    %353 = vector.broadcast %351 : f32 to vector<1x128xf32>
    %354 = arith.mulf %353, %352 : vector<1x128xf32>
    %355 = arith.addf %349, %354 : vector<1x128xf32>
    %356 = arith.addf %355, %0 : vector<1x128xf32>
    %c0_162 = arith.constant 0 : index
    %357 = arith.index_cast %c4_i32 : i32 to index
    %c0_163 = arith.constant 0 : index
    %358 = vector.load %arg7[%c0_162, %357, %c0_163] : memref<1x8x128xf32, #tpu.memory_space<vmem>>, vector<1x1x128xf32>
    %359 = vector.shape_cast %358 : vector<1x1x128xf32> to vector<1x128xf32>
    %360 = vector.shape_cast %356 : vector<1x128xf32> to vector<1x1x128xf32>
    tpu.vector_store %arg7[%c0_162, %357, %c0_163], %360 {strides = array<i32>} : memref<1x8x128xf32, #tpu.memory_space<vmem>>, vector<1x1x128xf32>,
    %c5_i32 = arith.constant 5 : i32
    %c0_164 = arith.constant 0 : index
    %c0_165 = arith.constant 0 : index
    %361 = arith.index_cast %c5_i32 : i32 to index
    %362 = memref.load %arg2[%c0_164, %c0_165, %361] : memref<1x4x8xi32, #tpu.memory_space<smem>>
    %c0_166 = arith.constant 0 : index
    %363 = arith.index_cast %362 : i32 to index
    %c0_167 = arith.constant 0 : index
    %364 = vector.load %arg4[%c0_166, %363, %c0_167] : memref<1x128x128xf32, #tpu.memory_space<vmem>>, vector<1x2x128xf32>
    %365 = vector.shape_cast %364 : vector<1x2x128xf32> to vector<2x128xf32>
    %c0_168 = arith.constant 0 : index
    %c1_169 = arith.constant 1 : index
    %366 = arith.index_cast %c5_i32 : i32 to index
    %367 = memref.load %arg2[%c0_168, %c1_169, %366] : memref<1x4x8xi32, #tpu.memory_space<smem>>
    %c0_170 = arith.constant 0 : index
    %368 = arith.index_cast %367 : i32 to index
    %c0_171 = arith.constant 0 : index
    %369 = vector.load %arg4[%c0_170, %368, %c0_171] : memref<1x128x128xf32, #tpu.memory_space<vmem>>, vector<1x2x128xf32>
    %370 = vector.shape_cast %369 : vector<1x2x128xf32> to vector<2x128xf32>
    %c0_172 = arith.constant 0 : index
    %c2_173 = arith.constant 2 : index
    %371 = arith.index_cast %c5_i32 : i32 to index
    %372 = memref.load %arg2[%c0_172, %c2_173, %371] : memref<1x4x8xi32, #tpu.memory_space<smem>>
    %c0_174 = arith.constant 0 : index
    %373 = arith.index_cast %372 : i32 to index
    %c0_175 = arith.constant 0 : index
    %374 = vector.load %arg5[%c0_174, %373, %c0_175] : memref<1x512x128xf32, #tpu.memory_space<vmem>>, vector<1x2x128xf32>
    %375 = vector.shape_cast %374 : vector<1x2x128xf32> to vector<2x128xf32>
    %c0_176 = arith.constant 0 : index
    %c3_177 = arith.constant 3 : index
    %376 = arith.index_cast %c5_i32 : i32 to index
    %377 = memref.load %arg2[%c0_176, %c3_177, %376] : memref<1x4x8xi32, #tpu.memory_space<smem>>
    %c0_178 = arith.constant 0 : index
    %378 = arith.index_cast %377 : i32 to index
    %c0_179 = arith.constant 0 : index
    %379 = vector.load %arg5[%c0_178, %378, %c0_179] : memref<1x512x128xf32, #tpu.memory_space<vmem>>, vector<1x2x128xf32>
    %380 = vector.shape_cast %379 : vector<1x2x128xf32> to vector<2x128xf32>
    %c0_180 = arith.constant 0 : index
    %c0_181 = arith.constant 0 : index
    %381 = arith.index_cast %c5_i32 : i32 to index
    %382 = memref.load %arg3[%c0_180, %c0_181, %381] : memref<1x8x8xf32, #tpu.memory_space<smem>>
    %383 = vector.extract_strided_slice %365 {offsets = [0, 0], sizes = [1, 128], strides = [1, 1]} : vector<2x128xf32> to vector<1x128xf32>
    %384 = vector.broadcast %382 : f32 to vector<1x128xf32>
    %385 = arith.mulf %384, %383 : vector<1x128xf32>
    %c0_182 = arith.constant 0 : index
    %c1_183 = arith.constant 1 : index
    %386 = arith.index_cast %c5_i32 : i32 to index
    %387 = memref.load %arg3[%c0_182, %c1_183, %386] : memref<1x8x8xf32, #tpu.memory_space<smem>>
    %388 = vector.extract_strided_slice %365 {offsets = [1, 0], sizes = [1, 128], strides = [1, 1]} : vector<2x128xf32> to vector<1x128xf32>
    %389 = vector.broadcast %387 : f32 to vector<1x128xf32>
    %390 = arith.mulf %389, %388 : vector<1x128xf32>
    %391 = arith.addf %385, %390 : vector<1x128xf32>
    %c0_184 = arith.constant 0 : index
    %c2_185 = arith.constant 2 : index
    %392 = arith.index_cast %c5_i32 : i32 to index
    %393 = memref.load %arg3[%c0_184, %c2_185, %392] : memref<1x8x8xf32, #tpu.memory_space<smem>>
    %394 = vector.extract_strided_slice %370 {offsets = [0, 0], sizes = [1, 128], strides = [1, 1]} : vector<2x128xf32> to vector<1x128xf32>
    %395 = vector.broadcast %393 : f32 to vector<1x128xf32>
    %396 = arith.mulf %395, %394 : vector<1x128xf32>
    %397 = arith.addf %391, %396 : vector<1x128xf32>
    %c0_186 = arith.constant 0 : index
    %c3_187 = arith.constant 3 : index
    %398 = arith.index_cast %c5_i32 : i32 to index
    %399 = memref.load %arg3[%c0_186, %c3_187, %398] : memref<1x8x8xf32, #tpu.memory_space<smem>>
    %400 = vector.extract_strided_slice %370 {offsets = [1, 0], sizes = [1, 128], strides = [1, 1]} : vector<2x128xf32> to vector<1x128xf32>
    %401 = vector.broadcast %399 : f32 to vector<1x128xf32>
    %402 = arith.mulf %401, %400 : vector<1x128xf32>
    %403 = arith.addf %397, %402 : vector<1x128xf32>
    %c0_188 = arith.constant 0 : index
    %c4_189 = arith.constant 4 : index
    %404 = arith.index_cast %c5_i32 : i32 to index
    %405 = memref.load %arg3[%c0_188, %c4_189, %404] : memref<1x8x8xf32, #tpu.memory_space<smem>>
    %406 = vector.extract_strided_slice %375 {offsets = [0, 0], sizes = [1, 128], strides = [1, 1]} : vector<2x128xf32> to vector<1x128xf32>
    %407 = vector.broadcast %405 : f32 to vector<1x128xf32>
    %408 = arith.mulf %407, %406 : vector<1x128xf32>
    %409 = arith.addf %403, %408 : vector<1x128xf32>
    %c0_190 = arith.constant 0 : index
    %c5_191 = arith.constant 5 : index
    %410 = arith.index_cast %c5_i32 : i32 to index
    %411 = memref.load %arg3[%c0_190, %c5_191, %410] : memref<1x8x8xf32, #tpu.memory_space<smem>>
    %412 = vector.extract_strided_slice %375 {offsets = [1, 0], sizes = [1, 128], strides = [1, 1]} : vector<2x128xf32> to vector<1x128xf32>
    %413 = vector.broadcast %411 : f32 to vector<1x128xf32>
    %414 = arith.mulf %413, %412 : vector<1x128xf32>
    %415 = arith.addf %409, %414 : vector<1x128xf32>
    %c0_192 = arith.constant 0 : index
    %c6_193 = arith.constant 6 : index
    %416 = arith.index_cast %c5_i32 : i32 to index
    %417 = memref.load %arg3[%c0_192, %c6_193, %416] : memref<1x8x8xf32, #tpu.memory_space<smem>>
    %418 = vector.extract_strided_slice %380 {offsets = [0, 0], sizes = [1, 128], strides = [1, 1]} : vector<2x128xf32> to vector<1x128xf32>
    %419 = vector.broadcast %417 : f32 to vector<1x128xf32>
    %420 = arith.mulf %419, %418 : vector<1x128xf32>
    %421 = arith.addf %415, %420 : vector<1x128xf32>
    %c0_194 = arith.constant 0 : index
    %c7_195 = arith.constant 7 : index
    %422 = arith.index_cast %c5_i32 : i32 to index
    %423 = memref.load %arg3[%c0_194, %c7_195, %422] : memref<1x8x8xf32, #tpu.memory_space<smem>>
    %424 = vector.extract_strided_slice %380 {offsets = [1, 0], sizes = [1, 128], strides = [1, 1]} : vector<2x128xf32> to vector<1x128xf32>
    %425 = vector.broadcast %423 : f32 to vector<1x128xf32>
    %426 = arith.mulf %425, %424 : vector<1x128xf32>
    %427 = arith.addf %421, %426 : vector<1x128xf32>
    %428 = arith.addf %427, %0 : vector<1x128xf32>
    %c0_196 = arith.constant 0 : index
    %429 = arith.index_cast %c5_i32 : i32 to index
    %c0_197 = arith.constant 0 : index
    %430 = vector.load %arg7[%c0_196, %429, %c0_197] : memref<1x8x128xf32, #tpu.memory_space<vmem>>, vector<1x1x128xf32>
    %431 = vector.shape_cast %430 : vector<1x1x128xf32> to vector<1x128xf32>
    %432 = vector.shape_cast %428 : vector<1x128xf32> to vector<1x1x128xf32>
    tpu.vector_store %arg7[%c0_196, %429, %c0_197], %432 {strides = array<i32>} : memref<1x8x128xf32, #tpu.memory_space<vmem>>, vector<1x1x128xf32>,
    %c6_i32 = arith.constant 6 : i32
    %c0_198 = arith.constant 0 : index
    %c0_199 = arith.constant 0 : index
    %433 = arith.index_cast %c6_i32 : i32 to index
    %434 = memref.load %arg2[%c0_198, %c0_199, %433] : memref<1x4x8xi32, #tpu.memory_space<smem>>
    %c0_200 = arith.constant 0 : index
    %435 = arith.index_cast %434 : i32 to index
    %c0_201 = arith.constant 0 : index
    %436 = vector.load %arg4[%c0_200, %435, %c0_201] : memref<1x128x128xf32, #tpu.memory_space<vmem>>, vector<1x2x128xf32>
    %437 = vector.shape_cast %436 : vector<1x2x128xf32> to vector<2x128xf32>
    %c0_202 = arith.constant 0 : index
    %c1_203 = arith.constant 1 : index
    %438 = arith.index_cast %c6_i32 : i32 to index
    %439 = memref.load %arg2[%c0_202, %c1_203, %438] : memref<1x4x8xi32, #tpu.memory_space<smem>>
    %c0_204 = arith.constant 0 : index
    %440 = arith.index_cast %439 : i32 to index
    %c0_205 = arith.constant 0 : index
    %441 = vector.load %arg4[%c0_204, %440, %c0_205] : memref<1x128x128xf32, #tpu.memory_space<vmem>>, vector<1x2x128xf32>
    %442 = vector.shape_cast %441 : vector<1x2x128xf32> to vector<2x128xf32>
    %c0_206 = arith.constant 0 : index
    %c2_207 = arith.constant 2 : index
    %443 = arith.index_cast %c6_i32 : i32 to index
    %444 = memref.load %arg2[%c0_206, %c2_207, %443] : memref<1x4x8xi32, #tpu.memory_space<smem>>
    %c0_208 = arith.constant 0 : index
    %445 = arith.index_cast %444 : i32 to index
    %c0_209 = arith.constant 0 : index
    %446 = vector.load %arg5[%c0_208, %445, %c0_209] : memref<1x512x128xf32, #tpu.memory_space<vmem>>, vector<1x2x128xf32>
    %447 = vector.shape_cast %446 : vector<1x2x128xf32> to vector<2x128xf32>
    %c0_210 = arith.constant 0 : index
    %c3_211 = arith.constant 3 : index
    %448 = arith.index_cast %c6_i32 : i32 to index
    %449 = memref.load %arg2[%c0_210, %c3_211, %448] : memref<1x4x8xi32, #tpu.memory_space<smem>>
    %c0_212 = arith.constant 0 : index
    %450 = arith.index_cast %449 : i32 to index
    %c0_213 = arith.constant 0 : index
    %451 = vector.load %arg5[%c0_212, %450, %c0_213] : memref<1x512x128xf32, #tpu.memory_space<vmem>>, vector<1x2x128xf32>
    %452 = vector.shape_cast %451 : vector<1x2x128xf32> to vector<2x128xf32>
    %c0_214 = arith.constant 0 : index
    %c0_215 = arith.constant 0 : index
    %453 = arith.index_cast %c6_i32 : i32 to index
    %454 = memref.load %arg3[%c0_214, %c0_215, %453] : memref<1x8x8xf32, #tpu.memory_space<smem>>
    %455 = vector.extract_strided_slice %437 {offsets = [0, 0], sizes = [1, 128], strides = [1, 1]} : vector<2x128xf32> to vector<1x128xf32>
    %456 = vector.broadcast %454 : f32 to vector<1x128xf32>
    %457 = arith.mulf %456, %455 : vector<1x128xf32>
    %c0_216 = arith.constant 0 : index
    %c1_217 = arith.constant 1 : index
    %458 = arith.index_cast %c6_i32 : i32 to index
    %459 = memref.load %arg3[%c0_216, %c1_217, %458] : memref<1x8x8xf32, #tpu.memory_space<smem>>
    %460 = vector.extract_strided_slice %437 {offsets = [1, 0], sizes = [1, 128], strides = [1, 1]} : vector<2x128xf32> to vector<1x128xf32>
    %461 = vector.broadcast %459 : f32 to vector<1x128xf32>
    %462 = arith.mulf %461, %460 : vector<1x128xf32>
    %463 = arith.addf %457, %462 : vector<1x128xf32>
    %c0_218 = arith.constant 0 : index
    %c2_219 = arith.constant 2 : index
    %464 = arith.index_cast %c6_i32 : i32 to index
    %465 = memref.load %arg3[%c0_218, %c2_219, %464] : memref<1x8x8xf32, #tpu.memory_space<smem>>
    %466 = vector.extract_strided_slice %442 {offsets = [0, 0], sizes = [1, 128], strides = [1, 1]} : vector<2x128xf32> to vector<1x128xf32>
    %467 = vector.broadcast %465 : f32 to vector<1x128xf32>
    %468 = arith.mulf %467, %466 : vector<1x128xf32>
    %469 = arith.addf %463, %468 : vector<1x128xf32>
    %c0_220 = arith.constant 0 : index
    %c3_221 = arith.constant 3 : index
    %470 = arith.index_cast %c6_i32 : i32 to index
    %471 = memref.load %arg3[%c0_220, %c3_221, %470] : memref<1x8x8xf32, #tpu.memory_space<smem>>
    %472 = vector.extract_strided_slice %442 {offsets = [1, 0], sizes = [1, 128], strides = [1, 1]} : vector<2x128xf32> to vector<1x128xf32>
    %473 = vector.broadcast %471 : f32 to vector<1x128xf32>
    %474 = arith.mulf %473, %472 : vector<1x128xf32>
    %475 = arith.addf %469, %474 : vector<1x128xf32>
    %c0_222 = arith.constant 0 : index
    %c4_223 = arith.constant 4 : index
    %476 = arith.index_cast %c6_i32 : i32 to index
    %477 = memref.load %arg3[%c0_222, %c4_223, %476] : memref<1x8x8xf32, #tpu.memory_space<smem>>
    %478 = vector.extract_strided_slice %447 {offsets = [0, 0], sizes = [1, 128], strides = [1, 1]} : vector<2x128xf32> to vector<1x128xf32>
    %479 = vector.broadcast %477 : f32 to vector<1x128xf32>
    %480 = arith.mulf %479, %478 : vector<1x128xf32>
    %481 = arith.addf %475, %480 : vector<1x128xf32>
    %c0_224 = arith.constant 0 : index
    %c5_225 = arith.constant 5 : index
    %482 = arith.index_cast %c6_i32 : i32 to index
    %483 = memref.load %arg3[%c0_224, %c5_225, %482] : memref<1x8x8xf32, #tpu.memory_space<smem>>
    %484 = vector.extract_strided_slice %447 {offsets = [1, 0], sizes = [1, 128], strides = [1, 1]} : vector<2x128xf32> to vector<1x128xf32>
    %485 = vector.broadcast %483 : f32 to vector<1x128xf32>
    %486 = arith.mulf %485, %484 : vector<1x128xf32>
    %487 = arith.addf %481, %486 : vector<1x128xf32>
    %c0_226 = arith.constant 0 : index
    %c6_227 = arith.constant 6 : index
    %488 = arith.index_cast %c6_i32 : i32 to index
    %489 = memref.load %arg3[%c0_226, %c6_227, %488] : memref<1x8x8xf32, #tpu.memory_space<smem>>
    %490 = vector.extract_strided_slice %452 {offsets = [0, 0], sizes = [1, 128], strides = [1, 1]} : vector<2x128xf32> to vector<1x128xf32>
    %491 = vector.broadcast %489 : f32 to vector<1x128xf32>
    %492 = arith.mulf %491, %490 : vector<1x128xf32>
    %493 = arith.addf %487, %492 : vector<1x128xf32>
    %c0_228 = arith.constant 0 : index
    %c7_229 = arith.constant 7 : index
    %494 = arith.index_cast %c6_i32 : i32 to index
    %495 = memref.load %arg3[%c0_228, %c7_229, %494] : memref<1x8x8xf32, #tpu.memory_space<smem>>
    %496 = vector.extract_strided_slice %452 {offsets = [1, 0], sizes = [1, 128], strides = [1, 1]} : vector<2x128xf32> to vector<1x128xf32>
    %497 = vector.broadcast %495 : f32 to vector<1x128xf32>
    %498 = arith.mulf %497, %496 : vector<1x128xf32>
    %499 = arith.addf %493, %498 : vector<1x128xf32>
    %500 = arith.addf %499, %0 : vector<1x128xf32>
    %c0_230 = arith.constant 0 : index
    %501 = arith.index_cast %c6_i32 : i32 to index
    %c0_231 = arith.constant 0 : index
    %502 = vector.load %arg7[%c0_230, %501, %c0_231] : memref<1x8x128xf32, #tpu.memory_space<vmem>>, vector<1x1x128xf32>
    %503 = vector.shape_cast %502 : vector<1x1x128xf32> to vector<1x128xf32>
    %504 = vector.shape_cast %500 : vector<1x128xf32> to vector<1x1x128xf32>
    tpu.vector_store %arg7[%c0_230, %501, %c0_231], %504 {strides = array<i32>} : memref<1x8x128xf32, #tpu.memory_space<vmem>>, vector<1x1x128xf32>,
    %c7_i32 = arith.constant 7 : i32
    %c0_232 = arith.constant 0 : index
    %c0_233 = arith.constant 0 : index
    %505 = arith.index_cast %c7_i32 : i32 to index
    %506 = memref.load %arg2[%c0_232, %c0_233, %505] : memref<1x4x8xi32, #tpu.memory_space<smem>>
    %c0_234 = arith.constant 0 : index
    %507 = arith.index_cast %506 : i32 to index
    %c0_235 = arith.constant 0 : index
    %508 = vector.load %arg4[%c0_234, %507, %c0_235] : memref<1x128x128xf32, #tpu.memory_space<vmem>>, vector<1x2x128xf32>
    %509 = vector.shape_cast %508 : vector<1x2x128xf32> to vector<2x128xf32>
    %c0_236 = arith.constant 0 : index
    %c1_237 = arith.constant 1 : index
    %510 = arith.index_cast %c7_i32 : i32 to index
    %511 = memref.load %arg2[%c0_236, %c1_237, %510] : memref<1x4x8xi32, #tpu.memory_space<smem>>
    %c0_238 = arith.constant 0 : index
    %512 = arith.index_cast %511 : i32 to index
    %c0_239 = arith.constant 0 : index
    %513 = vector.load %arg4[%c0_238, %512, %c0_239] : memref<1x128x128xf32, #tpu.memory_space<vmem>>, vector<1x2x128xf32>
    %514 = vector.shape_cast %513 : vector<1x2x128xf32> to vector<2x128xf32>
    %c0_240 = arith.constant 0 : index
    %c2_241 = arith.constant 2 : index
    %515 = arith.index_cast %c7_i32 : i32 to index
    %516 = memref.load %arg2[%c0_240, %c2_241, %515] : memref<1x4x8xi32, #tpu.memory_space<smem>>
    %c0_242 = arith.constant 0 : index
    %517 = arith.index_cast %516 : i32 to index
    %c0_243 = arith.constant 0 : index
    %518 = vector.load %arg5[%c0_242, %517, %c0_243] : memref<1x512x128xf32, #tpu.memory_space<vmem>>, vector<1x2x128xf32>
    %519 = vector.shape_cast %518 : vector<1x2x128xf32> to vector<2x128xf32>
    %c0_244 = arith.constant 0 : index
    %c3_245 = arith.constant 3 : index
    %520 = arith.index_cast %c7_i32 : i32 to index
    %521 = memref.load %arg2[%c0_244, %c3_245, %520] : memref<1x4x8xi32, #tpu.memory_space<smem>>
    %c0_246 = arith.constant 0 : index
    %522 = arith.index_cast %521 : i32 to index
    %c0_247 = arith.constant 0 : index
    %523 = vector.load %arg5[%c0_246, %522, %c0_247] : memref<1x512x128xf32, #tpu.memory_space<vmem>>, vector<1x2x128xf32>
    %524 = vector.shape_cast %523 : vector<1x2x128xf32> to vector<2x128xf32>
    %c0_248 = arith.constant 0 : index
    %c0_249 = arith.constant 0 : index
    %525 = arith.index_cast %c7_i32 : i32 to index
    %526 = memref.load %arg3[%c0_248, %c0_249, %525] : memref<1x8x8xf32, #tpu.memory_space<smem>>
    %527 = vector.extract_strided_slice %509 {offsets = [0, 0], sizes = [1, 128], strides = [1, 1]} : vector<2x128xf32> to vector<1x128xf32>
    %528 = vector.broadcast %526 : f32 to vector<1x128xf32>
    %529 = arith.mulf %528, %527 : vector<1x128xf32>
    %c0_250 = arith.constant 0 : index
    %c1_251 = arith.constant 1 : index
    %530 = arith.index_cast %c7_i32 : i32 to index
    %531 = memref.load %arg3[%c0_250, %c1_251, %530] : memref<1x8x8xf32, #tpu.memory_space<smem>>
    %532 = vector.extract_strided_slice %509 {offsets = [1, 0], sizes = [1, 128], strides = [1, 1]} : vector<2x128xf32> to vector<1x128xf32>
    %533 = vector.broadcast %531 : f32 to vector<1x128xf32>
    %534 = arith.mulf %533, %532 : vector<1x128xf32>
    %535 = arith.addf %529, %534 : vector<1x128xf32>
    %c0_252 = arith.constant 0 : index
    %c2_253 = arith.constant 2 : index
    %536 = arith.index_cast %c7_i32 : i32 to index
    %537 = memref.load %arg3[%c0_252, %c2_253, %536] : memref<1x8x8xf32, #tpu.memory_space<smem>>
    %538 = vector.extract_strided_slice %514 {offsets = [0, 0], sizes = [1, 128], strides = [1, 1]} : vector<2x128xf32> to vector<1x128xf32>
    %539 = vector.broadcast %537 : f32 to vector<1x128xf32>
    %540 = arith.mulf %539, %538 : vector<1x128xf32>
    %541 = arith.addf %535, %540 : vector<1x128xf32>
    %c0_254 = arith.constant 0 : index
    %c3_255 = arith.constant 3 : index
    %542 = arith.index_cast %c7_i32 : i32 to index
    %543 = memref.load %arg3[%c0_254, %c3_255, %542] : memref<1x8x8xf32, #tpu.memory_space<smem>>
    %544 = vector.extract_strided_slice %514 {offsets = [1, 0], sizes = [1, 128], strides = [1, 1]} : vector<2x128xf32> to vector<1x128xf32>
    %545 = vector.broadcast %543 : f32 to vector<1x128xf32>
    %546 = arith.mulf %545, %544 : vector<1x128xf32>
    %547 = arith.addf %541, %546 : vector<1x128xf32>
    %c0_256 = arith.constant 0 : index
    %c4_257 = arith.constant 4 : index
    %548 = arith.index_cast %c7_i32 : i32 to index
    %549 = memref.load %arg3[%c0_256, %c4_257, %548] : memref<1x8x8xf32, #tpu.memory_space<smem>>
    %550 = vector.extract_strided_slice %519 {offsets = [0, 0], sizes = [1, 128], strides = [1, 1]} : vector<2x128xf32> to vector<1x128xf32>
    %551 = vector.broadcast %549 : f32 to vector<1x128xf32>
    %552 = arith.mulf %551, %550 : vector<1x128xf32>
    %553 = arith.addf %547, %552 : vector<1x128xf32>
    %c0_258 = arith.constant 0 : index
    %c5_259 = arith.constant 5 : index
    %554 = arith.index_cast %c7_i32 : i32 to index
    %555 = memref.load %arg3[%c0_258, %c5_259, %554] : memref<1x8x8xf32, #tpu.memory_space<smem>>
    %556 = vector.extract_strided_slice %519 {offsets = [1, 0], sizes = [1, 128], strides = [1, 1]} : vector<2x128xf32> to vector<1x128xf32>
    %557 = vector.broadcast %555 : f32 to vector<1x128xf32>
    %558 = arith.mulf %557, %556 : vector<1x128xf32>
    %559 = arith.addf %553, %558 : vector<1x128xf32>
    %c0_260 = arith.constant 0 : index
    %c6_261 = arith.constant 6 : index
    %560 = arith.index_cast %c7_i32 : i32 to index
    %561 = memref.load %arg3[%c0_260, %c6_261, %560] : memref<1x8x8xf32, #tpu.memory_space<smem>>
    %562 = vector.extract_strided_slice %524 {offsets = [0, 0], sizes = [1, 128], strides = [1, 1]} : vector<2x128xf32> to vector<1x128xf32>
    %563 = vector.broadcast %561 : f32 to vector<1x128xf32>
    %564 = arith.mulf %563, %562 : vector<1x128xf32>
    %565 = arith.addf %559, %564 : vector<1x128xf32>
    %c0_262 = arith.constant 0 : index
    %c7_263 = arith.constant 7 : index
    %566 = arith.index_cast %c7_i32 : i32 to index
    %567 = memref.load %arg3[%c0_262, %c7_263, %566] : memref<1x8x8xf32, #tpu.memory_space<smem>>
    %568 = vector.extract_strided_slice %524 {offsets = [1, 0], sizes = [1, 128], strides = [1, 1]} : vector<2x128xf32> to vector<1x128xf32>
    %569 = vector.broadcast %567 : f32 to vector<1x128xf32>
    %570 = arith.mulf %569, %568 : vector<1x128xf32>
    %571 = arith.addf %565, %570 : vector<1x128xf32>
    %572 = arith.addf %571, %0 : vector<1x128xf32>
    %c0_264 = arith.constant 0 : index
    %573 = arith.index_cast %c7_i32 : i32 to index
    %c0_265 = arith.constant 0 : index
    %574 = vector.load %arg7[%c0_264, %573, %c0_265] : memref<1x8x128xf32, #tpu.memory_space<vmem>>, vector<1x1x128xf32>
    %575 = vector.shape_cast %574 : vector<1x1x128xf32> to vector<1x128xf32>
    %576 = vector.shape_cast %572 : vector<1x128xf32> to vector<1x1x128xf32>
    tpu.vector_store %arg7[%c0_264, %573, %c0_265], %576 {strides = array<i32>} : memref<1x8x128xf32, #tpu.memory_space<vmem>>, vector<1x1x128xf32>,
    %c8_i32 = arith.constant 8 : i32
    return
  }
  func.func @transform_0(%arg0: i32, %arg1: i32) -> (i32, i32, i32) {
    %c0_i32 = arith.constant 0 : i32
    %c0_i32_0 = arith.constant 0 : i32
    return %arg0, %c0_i32, %arg1 : i32, i32, i32
  }
  func.func @transform_1(%arg0: i32, %arg1: i32) -> (i32, i32, i32) {
    %c0_i32 = arith.constant 0 : i32
    %c0_i32_0 = arith.constant 0 : i32
    return %arg0, %c0_i32, %arg1 : i32, i32, i32
  }
  func.func @transform_2(%arg0: i32, %arg1: i32) -> (i32, i32, i32) {
    %c0_i32 = arith.constant 0 : i32
    %c0_i32_0 = arith.constant 0 : i32
    %c0_i32_1 = arith.constant 0 : i32
    return %arg0, %c0_i32, %c0_i32_0 : i32, i32, i32
  }
  func.func @transform_3(%arg0: i32, %arg1: i32) -> (i32, i32, i32) {
    %c0_i32 = arith.constant 0 : i32
    %c0_i32_0 = arith.constant 0 : i32
    %c0_i32_1 = arith.constant 0 : i32
    return %arg0, %c0_i32, %c0_i32_0 : i32, i32, i32
  }
  func.func @transform_4(%arg0: i32, %arg1: i32) -> (i32, i32) {
    %c0_i32 = arith.constant 0 : i32
    %c0_i32_0 = arith.constant 0 : i32
    %c0_i32_1 = arith.constant 0 : i32
    return %c0_i32, %c0_i32_0 : i32, i32
  }
  func.func @transform_5(%arg0: i32, %arg1: i32) -> (i32, i32, i32) {
    %c0_i32 = arith.constant 0 : i32
    %c0_i32_0 = arith.constant 0 : i32
    return %arg0, %arg1, %c0_i32 : i32, i32, i32
  }
}

</mosaic_0001>

<bundles_post_ra>
// kernel: tpu_custom_call.1
= control target key start
LH: loop header
LB: loop body
LE: loop exit
PB: predicated region body
PF: predicated region fallthrough
CT: control target
= control target key end

     0   :  { %s2099_s0 = inlined_call_operand.hbm [shape: s32[2,4,8], index: 0, kind: input, shape index: {}]   ;;  %s2100_s1 = inlined_call_operand.hbm [shape: f32[2,8,8], index: 1, kind: input, shape index: {}]   ;;  %s2101_s2 = inlined_call_operand.hbm [shape: f32[2,128,128], index: 2, kind: input, shape index: {}]   ;;  %s2102_s3 = inlined_call_operand.hbm [shape: f32[2,512,128], index: 3, kind: input, shape index: {}]   ;;  %s2103_s4 = inlined_call_operand.vmem [shape: f32[1,128], index: 4, kind: input, shape index: {}]   ;;  %s2104_s5 = inlined_call_operand.hbm [shape: f32[2,8,128], index: 5, kind: output, shape index: {}]  }
   0x1   :  { %2113 = sst [smem:[#allocation25_spill]] %s2099_s0 }
   0x2   :  { %2114 = sst [smem:[#allocation26_spill]] %s2100_s1 }
   0x3   :  { %2115 = sst [smem:[#allocation27_spill]] %s2101_s2 }
   0x4   :  { %2116 = sst [smem:[#allocation28_spill]] %s2102_s3 }
   0x5   :  { %10 = vsyncpa [#allocation5], 0 }
   0x6   :  { %12 = vsyncpa [#allocation5 + $0x1], 0 }
   0x7   :  { %13 = vsyncpa [#allocation7], 0 }
   0x8   :  { %15 = vsyncpa [#allocation7 + $0x1], 0 }
   0x9   :  { %16 = vsyncpa [#allocation3], 0 }
   0xa   :  { %18 = vsyncpa [#allocation3 + $0x1], 0 }
   0xb   :  { %19 = vsyncpa [#allocation10], 0 }
   0xc   :  { %21 = vsyncpa [#allocation10 + $0x1], 0 }
   0xd   :  { %22 = vsyncpa [#allocation4], 0 }
   0xe   :  { %24 = vsyncpa [#allocation4 + $0x1], 0  ;;  %s1489_s18 = smov 0   ;;  %s1491_s19 = smov 0  }
   0xf   :  { %s1493_s20 = smov 0   ;;  %s1495_s21 = smov 0  }
  0x10   :  { %s1497_s22 = smov 0   ;;  %s1499_s23 = smov 0  }
  0x11 LB: > { %2117 = sst [smem:[#allocation17_spill]] %s1372_s18  ;;  %s1038_s24 = sadd.s32 4294967295, %s1392_s23   ;;  %s1392_s23 = sphi %s1499_s23, %s30_s23   ;;  %s1388_s22 = sphi %s1497_s22, %s2143_s22   ;;  %s1384_s21 = sphi %s1495_s21, %s2142_s21   ;;  %s1380_s20 = sphi %s1493_s20, %s2141_s20   ;;  %s1376_s19 = sphi %s1491_s19, %s2140_s19   ;;  %s1372_s18 = sphi %s1489_s18, %s2139_s18  }
  0x12   : > { %2118 = sst [smem:[#allocation18_spill]] %s1376_s19  ;;  %s1039_s25 = sadd.s32 4294967294, %s1392_s23  }
  0x13   : > { %2119 = sst [smem:[#allocation19_spill]] %s1380_s20  ;;  %s42_s26 = sadd.s32 1, %s1388_s22 }
  0x14   : > { %2120 = sst [smem:[#allocation20_spill]] %s1388_s22  ;;  %s51_s27 = sadd.s32 1, %s1380_s20 }
  0x15   : > { %2121 = sst [smem:[#allocation21_spill]] %s1392_s23  ;;  %p44_p0 = scmp.ge.s32.totalorder %s42_s26, 2 }
  0x16   : > { %p58_p1 = scmp.ne.s32.totalorder %s1380_s20, %s1376_s19  ;;  %p59_p2 = scmp.eq.s32.totalorder %s1392_s23, 0 }
  0x17   : > { %p64_p3 = scmp.ne.s32.totalorder %s1376_s19, %s1372_s18  ;;  %s2145_s26 = smov (%p44_p0, %s42_s26), 0 }
  0x18   : > { %2122 = sst [smem:[#allocation22_spill]] %s2145_s26  ;;  %p1530_p4 = por %p59_p2, %p58_p1 }
  0x19   : > { %p65_p5 = scmp.eq.s32.totalorder %s1038_s24, 0  ;;  %s46_s29 = ssub.s32 %s1388_s22, %s2145_s26 }
  0x1a   : > { %p191_p6 = scmp.eq.s32.totalorder %s1038_s24, 1  ;;  %p49_p7 = scmp.eq.s32.totalorder %s46_s29, 0 }
  0x1b   : > { %p1536_p8 = por %p65_p5, %p64_p3  ;;  %p197_p10 = scmp.eq.s32.totalorder %s1039_s25, 1 }
  0x1c   : > { %p1540_p9 = por %p191_p6, %p58_p1  ;;  %p1041_p12 = scmp.ge.s32.totalorder %s1392_s23, 2 }
  0x1d   : > { %s1545_s7 = scalar_select %p49_p7, %s1380_s20, %s51_s27  }
  0x1e   : > { %p1547_p11 = por %p197_p10, %p64_p3  ;;  %p1093_p13 = scmp.lt.s32.totalorder %s1392_s23, 2 }
  0x1f   : > { %2126 = sst [smem:[#allocation23_spill]] %s1545_s7  ;;  %s1554_s9 = sand.u32 1, %s1380_s20  }
  0x20   : > { %s2127_s8 = scalar_select %p1547_p11, 1, 0 }
  0x21   : > { %s1042_s10 = sshll.u32 %s1554_s9, 9  ;;  %s1043_s11 = sshll.u32 %s1388_s22, 2 }
  0x22   : > { %2128 = sst [smem:[#allocation24_spill]] %s2127_s8  ;;  %p1563_p0 = pnand %p1093_p13, %p1530_p4 }
  0x23   : > { %s2129_s0 = sld [smem:[#allocation25_spill]]  ;;  %s224_s17 = scalar_lea.smem [#allocation2], %s1042_s10 }
  0x24   : > { %s221_s24 = scalar_lea.sflag [#allocation5], %s1554_s9  ;;  %p1052_p1 = scmp.ge.s32.totalorder %s1392_s23, 1 }
  0x25   : > { %s282_s25 = scalar_lea.vmem [#allocation9], %s1042_s10  ;;  %p298_p2 = scmp.lt.s32.totalorder %s1392_s23, 3 }
  0x26   : > { %s290_s27 = sshll.u32 %s282_s25, 4  ;;  %s1044_s29 = sshll.u32 %s1554_s9, 10  ;;  %s291_s27 = int_to_ptr.vmem [resolvable:$true] %s290_s27 }
  0x27   : > { %p1573_p3 = pnand %p1052_p1, %p298_p2  ;;  %s2132_s1 = sld [smem:[#allocation26_spill]] }
  0x28   : > { %s242_s10 = scalar_lea.smem [#allocation6], %s1044_s29  ;;  %s2133_s2 = sld [smem:[#allocation27_spill]] }
  0x29   : > { %s229_s14 = scalar_lea.hbm %s2129_s0, %s1043_s11  ;;  %s1045_s11 = sshll.u32 %s1388_s22, 3 }
  0x2a   : > { %s231_s16 = sshll.u32 %s229_s14, 4  ;;  %s1046_s0 = sshll.u32 %s1554_s9, 7  ;;  %s232_s16 = int_to_ptr.hbm [resolvable:$true] %s231_s16 }
  0x2b   : > { %1079 = dma.hbm_to_smem (!%p1563_p0), %s232_s16, 64, %s224_s17, %s221_s24  }
  0x2c   : > { %s1064_s16 = sshll.u32 %s1388_s22, 7  ;;  %s239_s17 = scalar_lea.sflag [#allocation7], %s1554_s9 }
  0x2d   : > { %s247_s14 = scalar_lea.hbm %s2132_s1, %s1045_s11  ;;  %s260_s20 = scalar_lea.vmem [#allocation8], %s1046_s0 }
  0x2e   : > { %s249_s26 = sshll.u32 %s247_s14, 4  ;;  %s265_s7 = scalar_lea.hbm %s2133_s2, %s1064_s16  ;;  %s250_s26 = int_to_ptr.hbm [resolvable:$true] %s249_s26 }
  0x2f   : > { %1082 = dma.hbm_to_smem (!%p1563_p0), %s250_s26, 128, %s242_s10, %s239_s17  }
  0x30   : > { %s268_s23 = sshll.u32 %s260_s20, 4  ;;  %s266_s12 = sshll.u32 %s265_s7, 4  ;;  %s269_s23 = int_to_ptr.vmem [resolvable:$true] %s268_s23  ;;  %s267_s12 = int_to_ptr.hbm [resolvable:$true] %s266_s12 }
  0x31   : > { %s257_s11 = scalar_lea.sflag [#allocation3], %s1554_s9  ;;  %s1394_s13 = smov 128  }
  0x32   : > { %s1395_s14 = smov 8   ;;  %s1065_s29 = sshll.u32 %s1388_s22, 9 }
  0x33   : > { %1085 = dma.hbm_to_vmem [thread:$0]  (!%p1563_p0), %s267_s12, 2048, %s269_s23, %s257_s11, %s1394_s13, %s1394_s13, %s1395_s14  }
  0x34   : > { %s2134_s3 = sld [smem:[#allocation28_spill]]  ;;  %s279_s16 = scalar_lea.sflag [#allocation10], %s1554_s9 }
  0x35   : > { %s1602_s0 = sand.u32 (!%p1573_p3), 1, %s1376_s19  }
  0x36   : > { %s1053_s20 = sshll.u32 (!%p1573_p3), %s1602_s0, 9  ;;  %s305_s23 = scalar_lea.sflag (!%p1573_p3), [#allocation5], %s1602_s0 }
  0x37   : > { %s1606_s7 = scalar_lea.smem (!%p1573_p3), [#allocation2], %s1053_s20 }
  0x38   : > { %302 = sbr.rel (%p1573_p3) target bundleno = 192 (0xc0), region = 40 }
  0x3a   : > { %s287_s10 = scalar_lea.hbm %s2134_s3, %s1065_s29 }
  0x3b   : > { %s288_s17 = sshll.u32 %s287_s10, 4  ;;  %s289_s17 = int_to_ptr.hbm [resolvable:$true] %s288_s17 }
  0x3c   : > { %1088 = dma.hbm_to_vmem [thread:$0]  (!%p1563_p0), %s289_s17, 8192, %s291_s27, %s279_s16, %s1394_s13, %s1394_s13, %s1395_s14  }
  0x3d   : > { %1351 = dma.done.wait (%p1536_p8), %s305_s23, 64  }
  0x3e   : > { %1353 = vsyncadd (%p1536_p8), %s305_s23, 4294967232  ;;  %s1054_s1 = sshll.u32 %s1602_s0, 10  ;;  %s315_s9 = scalar_lea.sflag [#allocation7], %s1602_s0 }
  0x3f   : > { %s1614_s15 = scalar_lea.smem [#allocation6], %s1054_s1 }
  0x40   : > { %1355 = dma.done.wait (%p1536_p8), %s315_s9, 128  }
  0x41   : > { %1357 = vsyncadd (%p1536_p8), %s315_s9, 4294967168  ;;  %s1055_s27 = sshll.u32 %s1602_s0, 7  ;;  %s325_s28 = scalar_lea.sflag [#allocation3], %s1602_s0 }
  0x42   : > { %s1622_s24 = scalar_lea.vmem [#allocation8], %s1055_s27 }
  0x43   : > { %1359 = dma.done.wait (%p1536_p8), %s325_s28, 2048  }
  0x44   : > { %1361 = vsyncadd (%p1536_p8), %s325_s28, 4294965248  ;;  %s335_s25 = scalar_lea.sflag [#allocation10], %s1602_s0  ;;  %s1629_s12 = scalar_lea.vmem [#allocation9], %s1053_s20 }
  0x45   : > { %1363 = dma.done.wait (%p1536_p8), %s335_s25, 8192  }
  0x46   : > { %1365 = vsyncadd (%p1536_p8), %s335_s25, 4294959104 }
  0x47   : > { %344 = sfence }
  0x48   : > { %s1058_s13 = sld [smem:[#allocation2 + %s1053_s20]]  ;;  %s1396_s14 = smov 128   ;;  %v1719_v42 = vld [vmem:[%s2103_s4] sm:$0x1] }
  0x49   : > { %s386_s29 = sld [smem:[%s1606_s7 + %s1396_s14]]  ;;  %s1397_s26 = smov 256  }
  0x4a   : > { %s389_s30 = sld [smem:[%s1606_s7 + %s1397_s26]]  ;;  %s1398_s10 = smov 384  }
  0x4b   : > { %s1639_s17 = sld [smem:[%s1606_s7 + %s1398_s10]]  ;;  %s1399_s20 = smov 512  }
  0x4c   : > { %s1059_s16 = sld [smem:[#allocation6 + %s1054_s1]]  ;;  %s1400_s22 = smov 640  }
  0x4d   : > { %s398_s9 = sld [smem:[%s1614_s15 + %s1396_s14]]  ;;  %s1401_s8 = smov 768  }
  0x4e   : > { %s384_s23 = scalar_lea.vmem %s1622_s24, %s1058_s13 [#allocation8]  ;;  %s405_s27 = sld [smem:[%s1614_s15 + %s1397_s26]] }
  0x4f   : > { %s387_s28 = scalar_lea.vmem %s1622_s24, %s386_s29 [#allocation8]  ;;  %s409_s25 = sld [smem:[%s1614_s15 + %s1398_s10]]  ;;  %v385_v0 = vld [vmem:[%s384_s23] sm:$0x3] }
  0x50   : > { %s390_s11 = scalar_lea.vmem %s1629_s12, %s389_s30 [#allocation9]  ;;  %s1648_s2 = sld [smem:[%s1614_s15 + %s1399_s20]]  ;;  %v388_v2 = vld [vmem:[%s387_s28] sm:$0x3] }
  0x51   : > { %s393_s3 = scalar_lea.vmem %s1629_s12, %s1639_s17 [#allocation9]  ;;  %s420_s19 = sld [smem:[%s1614_s15 + %s1400_s22]]  ;;  %v391_v7 = vld [vmem:[%s390_s11] sm:$0x3] }
  0x52   : > { %v396_v1 = vstv %s1059_s16  ;;  %s1654_s18 = sld [smem:[%s1614_s15 + %s1401_s8]]  ;;  %s1402_s1 = smov 896   ;;  %v394_v14 = vld [vmem:[%s393_s3] sm:$0x3] }
  0x53   : > { %v399_v3 = vstv %s398_s9  ;;  %s1657_s13 = sld [smem:[%s1614_s15 + %s1402_s1]]  ;;  %v397_v4 = vmul.f32 %v396_v1, %v385_v0  ;;  %s1403_s14 = smov 1  }
  0x54   : > { %v400_v5 = vmul.f32 %v399_v3, %v385_v0  ;;  %v406_v6 = vstv %s405_s27  ;;  %s1660_s29 = sld [smem:[%s1606_s7 + %s1403_s14]]  ;;  %s1404_s22 = smov 129  }
  0x55   : > { %v410_v8 = vstv %s409_s25  ;;  %s1663_s8 = sld [smem:[%s1606_s7 + %s1404_s22]]  ;;  %v407_v10 = vmul.f32 %v406_v6, %v388_v2  ;;  %s1405_s26 = smov 257  }
  0x56   : > { %v402_v9 = vrot.slane %v400_v5, 1  ;;  %v411_v11 = vmul.f32 %v410_v8, %v388_v2  ;;  %s1666_s30 = sld [smem:[%s1606_s7 + %s1405_s26]]  ;;  %v417_v12 = vstv %s1648_s2  ;;  %s1406_s11 = smov 385  }
  0x57   : > { %v421_v13 = vstv %s420_s19  ;;  %s1670_s10 = sld [smem:[%s1606_s7 + %s1406_s11]]  ;;  %v418_v20 = vmul.f32 %v417_v12, %v391_v7  ;;  %s1407_s27 = smov 513  }
  0x58   : > { %v404_v15 = vadd.f32 %v402_v9, %v397_v4  ;;  %v413_v16 = vrot.slane %v411_v11, 1  ;;  %v422_v17 = vmul.f32 %v421_v13, %v391_v7  ;;  %s1673_s17 = sld [smem:[%s1614_s15 + %s1403_s14]]  ;;  %v428_v21 = vstv %s1654_s18  ;;  %s1408_s20 = smov 641  }
  0x59   : > { %v432_v18 = vstv %s1657_s13  ;;  %s455_s2 = sld [smem:[%s1614_s15 + %s1404_s22]]  ;;  %v429_v27 = vmul.f32 %v428_v21, %v394_v14  ;;  %s1409_s18 = smov 769  }
  0x5a   : > { %v408_v19 = vadd.f32 %v407_v10, %v404_v15  ;;  %s441_s19 = scalar_lea.vmem %s1622_s24, %s1660_s29 [#allocation8]  ;;  %s1680_s16 = sld [smem:[%s1614_s15 + %s1405_s26]]  ;;  %v433_v22 = vmul.f32 %v432_v18, %v394_v14  ;;  %v424_v24 = vrot.slane %v422_v17, 1 }
  0x5b   : > { %s444_s3 = scalar_lea.vmem %s1622_s24, %s1663_s8 [#allocation8]  ;;  %s1686_s23 = sld [smem:[%s1614_s15 + %s1406_s11]]  ;;  %v442_v25 = vld [vmem:[%s441_s19] sm:$0x3] }
  0x5c   : > { %v415_v23 = vadd.f32 %v413_v16, %v408_v19  ;;  %s447_s9 = scalar_lea.vmem %s1629_s12, %s1666_s30 [#allocation9]  ;;  %s1691_s28 = sld [smem:[%s1614_s15 + %s1407_s27]]  ;;  %v435_v29 = vrot.slane %v433_v22, 1  ;;  %v445_v30 = vld [vmem:[%s444_s3] sm:$0x3] }
  0x5d   : > { %s450_s25 = scalar_lea.vmem %s1629_s12, %s1670_s10 [#allocation9]  ;;  %s1696_s1 = sld [smem:[%s1614_s15 + %s1408_s20]]  ;;  %v448_v36 = vld [vmem:[%s447_s9] sm:$0x3] }
  0x5e   : > { %v419_v26 = vadd.f32 %v418_v20, %v415_v23  ;;  %v453_v28 = vstv %s1673_s17  ;;  %s1700_s13 = sld [smem:[%s1614_s15 + %s1409_s18]]  ;;  %s1410_s14 = smov 897   ;;  %v451_v46 = vld [vmem:[%s450_s25] sm:$0x3] }
  0x5f   : > { %v456_v31 = vstv %s455_s2  ;;  %s1703_s29 = sld [smem:[%s1614_s15 + %s1410_s14]]  ;;  %v454_v33 = vmul.f32 %v453_v28, %v442_v25  ;;  %s1411_s22 = smov 2  }
  0x60   : > { %v426_v32 = vadd.f32 %v424_v24, %v419_v26  ;;  %v457_v34 = vmul.f32 %v456_v31, %v442_v25  ;;  %v463_v35 = vstv %s1680_s16  ;;  %s1707_s8 = sld [smem:[%s1606_s7 + %s1411_s22]]  ;;  %s1412_s26 = smov 130  }
  0x61   : > { %v467_v37 = vstv %s1686_s23  ;;  %s1711_s30 = sld [smem:[%s1606_s7 + %s1412_s26]]  ;;  %v464_v40 = vmul.f32 %v463_v35, %v445_v30  ;;  %s1413_s11 = smov 258  }
  0x62   : > { %v430_v38 = vadd.f32 %v429_v27, %v426_v32  ;;  %v459_v39 = vrot.slane %v457_v34, 1  ;;  %v468_v41 = vmul.f32 %v467_v37, %v445_v30  ;;  %s1714_s17 = sld [smem:[%s1606_s7 + %s1413_s11]]  ;;  %v474_v43 = vstv %s1691_s28  ;;  %s1414_s16 = smov 386  }
  0x63   : > { %v478_v44 = vstv %s1696_s1  ;;  %s1724_s3 = sld [smem:[%s1606_s7 + %s1414_s16]]  ;;  %v475_v53 = vmul.f32 %v474_v43, %v448_v36  ;;  %s2135_s20 = sshll.u32 %s1602_s0, 3 }
  0x64   : > { %v437_v45 = vadd.f32 %v435_v29, %v430_v38  ;;  %v461_v47 = vadd.f32 %v459_v39, %v454_v33  ;;  %v470_v48 = vrot.slane %v468_v41, 1  ;;  %v479_v49 = vmul.f32 %v478_v44, %v448_v36  ;;  %s1730_s23 = sld [smem:[%s1614_s15 + %s1411_s22]]  ;;  %s1750_s1 = scalar_lea.vmem [#allocation11], %s2135_s20 }
  0x65   : > { %v489_v50 = vstv %s1703_s29  ;;  %s1734_s9 = sld [smem:[%s1614_s15 + %s1412_s26]]  ;;  %v485_v54 = vstv %s1700_s13  ;;  %s1415_s14 = smov 514  }
  0x66   : > { %v438_v51 = vadd.f32 %v437_v45, %v1719_v42  ;;  %v465_v52 = vadd.f32 %v464_v40, %v461_v47  ;;  %s498_s10 = scalar_lea.vmem %s1622_s24, %s1707_s8 [#allocation8]  ;;  %s1740_s27 = sld [smem:[%s1614_s15 + %s1413_s11]]  ;;  %v490_v55 = vmul.f32 %v489_v50, %v451_v46  ;;  %v481_v57 = vrot.slane %v479_v49, 1 }
  0x67   : > { %s501_s28 = scalar_lea.vmem %s1622_s24, %s1711_s30 [#allocation8]  ;;  %s1746_s25 = sld [smem:[%s1614_s15 + %s1414_s16]]  ;;  %v499_v58 = vld [vmem:[%s498_s10] sm:$0x3]  ;;  %v486_v60 = vmul.f32 %v485_v54, %v451_v46 }
  0x68   : > { %439 = vst [vmem:[%s1750_s1] sm:$0x1] %v438_v51  ;;  %v472_v56 = vadd.f32 %v470_v48, %v465_v52  ;;  %s504_s18 = scalar_lea.vmem %s1629_s12, %s1714_s17 [#allocation9]  ;;  %s1756_s29 = sld [smem:[%s1614_s15 + %s1415_s14]]  ;;  %v492_v62 = vrot.slane %v490_v55, 1  ;;  %v502_v63 = vld [vmem:[%s501_s28] sm:$0x3] }
  0x69   : > { %s507_s13 = scalar_lea.vmem %s1629_s12, %s1724_s3 [#allocation9]  ;;  %s1416_s22 = smov 642   ;;  %v505_v5 = vld [vmem:[%s504_s18] sm:$0x3] }
  0x6a   : > { %s1761_s8 = sld [smem:[%s1614_s15 + %s1416_s22]]  ;;  %v476_v59 = vadd.f32 %v475_v53, %v472_v56  ;;  %v510_v61 = vstv %s1730_s23  ;;  %s1417_s26 = smov 770   ;;  %v508_v14 = vld [vmem:[%s507_s13] sm:$0x3] }
  0x6b   : > { %s1765_s30 = sld [smem:[%s1614_s15 + %s1417_s26]]  ;;  %v513_v0 = vstv %s1734_s9  ;;  %s1418_s11 = smov 898   ;;  %v511_v2 = vmul.f32 %v510_v61, %v499_v58 }
  0x6c   : > { %s1769_s17 = sld [smem:[%s1614_s15 + %s1418_s11]]  ;;  %v483_v1 = vadd.f32 %v481_v57, %v476_v59  ;;  %v514_v3 = vmul.f32 %v513_v0, %v499_v58  ;;  %v520_v4 = vstv %s1740_s27  ;;  %s1419_s2 = smov 3  }
  0x6d   : > { %s1773_s19 = sld [smem:[%s1606_s7 + %s1419_s2]]  ;;  %v524_v6 = vstv %s1746_s25  ;;  %s1420_s16 = smov 131   ;;  %v521_v9 = vmul.f32 %v520_v4, %v502_v63 }
  0x6e   : > { %s1777_s23 = sld [smem:[%s1606_s7 + %s1420_s16]]  ;;  %v487_v7 = vadd.f32 %v486_v60, %v483_v1  ;;  %v516_v8 = vrot.slane %v514_v3, 1  ;;  %v525_v10 = vmul.f32 %v524_v6, %v502_v63  ;;  %s1421_s9 = smov 259   ;;  %v531_v11 = vstv %s1756_s29 }
  0x6f   : > { %s1780_s10 = sld [smem:[%s1606_s7 + %s1421_s9]]  ;;  %s1422_s27 = smov 387   ;;  %v532_v21 = vmul.f32 %v531_v11, %v505_v5 }
  0x70   : > { %v535_v12 = vstv %s1761_s8  ;;  %s1785_s28 = sld [smem:[%s1606_s7 + %s1422_s27]]  ;;  %v494_v13 = vadd.f32 %v492_v62, %v487_v7  ;;  %v518_v15 = vadd.f32 %v516_v8, %v511_v2  ;;  %v527_v16 = vrot.slane %v525_v10, 1  ;;  %s1423_s22 = smov 515  }
  0x71   : > { %v536_v17 = vmul.f32 %v535_v12, %v505_v5  ;;  %s1791_s25 = sld [smem:[%s1614_s15 + %s1419_s2]]  ;;  %v542_v22 = vstv %s1765_s30  ;;  %s1424_s11 = smov 643  }
  0x72   : > { %v546_v18 = vstv %s1769_s17  ;;  %s1795_s20 = sld [smem:[%s1614_s15 + %s1420_s16]]  ;;  %v495_v19 = vadd.f32 %v494_v13, %v1719_v42  ;;  %v522_v20 = vadd.f32 %v521_v9, %v518_v15  ;;  %v543_v28 = vmul.f32 %v542_v22, %v508_v14  ;;  %s1425_s17 = smov 771  }
  0x73   : > { %s555_s3 = scalar_lea.vmem %s1622_s24, %s1773_s19 [#allocation8]  ;;  %s1801_s18 = sld [smem:[%s1614_s15 + %s1421_s9]]  ;;  %v547_v23 = vmul.f32 %v546_v18, %v508_v14  ;;  %v538_v25 = vrot.slane %v536_v17, 1 }
  0x74   : > { %s558_s14 = scalar_lea.vmem %s1622_s24, %s1777_s23 [#allocation8]  ;;  %s1807_s29 = sld [smem:[%s1614_s15 + %s1422_s27]]  ;;  %496 = vst [vmem:[%s1750_s1 + $0x1] sm:$0x1] %v495_v19  ;;  %v529_v24 = vadd.f32 %v527_v16, %v522_v20  ;;  %v556_v26 = vld [vmem:[%s555_s3] sm:$0x3] }
  0x75   : > { %s561_s13 = scalar_lea.vmem %s1629_s12, %s1780_s10 [#allocation9]  ;;  %s1813_s8 = sld [smem:[%s1614_s15 + %s1423_s22]]  ;;  %v549_v30 = vrot.slane %v547_v23, 1  ;;  %v559_v31 = vld [vmem:[%s558_s14] sm:$0x3] }
  0x76   : > { %s564_s26 = scalar_lea.vmem %s1629_s12, %s1785_s28 [#allocation9]  ;;  %s1818_s30 = sld [smem:[%s1614_s15 + %s1424_s11]]  ;;  %v533_v27 = vadd.f32 %v532_v21, %v529_v24  ;;  %v562_v37 = vld [vmem:[%s561_s13] sm:$0x3] }
  0x77   : > { %v567_v29 = vstv %s1791_s25  ;;  %s1822_s2 = sld [smem:[%s1614_s15 + %s1425_s17]]  ;;  %s1426_s19 = smov 899   ;;  %v565_v47 = vld [vmem:[%s564_s26] sm:$0x3] }
  0x78   : > { %v570_v32 = vstv %s1795_s20  ;;  %s1826_s16 = sld [smem:[%s1614_s15 + %s1426_s19]]  ;;  %v540_v33 = vadd.f32 %v538_v25, %v533_v27  ;;  %v568_v34 = vmul.f32 %v567_v29, %v556_v26  ;;  %s1427_s23 = smov 4  }
  0x79   : > { %v571_v35 = vmul.f32 %v570_v32, %v556_v26  ;;  %v577_v36 = vstv %s1801_s18  ;;  %s1830_s9 = sld [smem:[%s1606_s7 + %s1427_s23]]  ;;  %s1428_s10 = smov 132  }
  0x7a   : > { %v581_v38 = vstv %s1807_s29  ;;  %s1834_s27 = sld [smem:[%s1606_s7 + %s1428_s10]]  ;;  %v544_v39 = vadd.f32 %v543_v28, %v540_v33  ;;  %v578_v41 = vmul.f32 %v577_v36, %v559_v31  ;;  %s1429_s25 = smov 260  }
  0x7b   : > { %v573_v40 = vrot.slane %v571_v35, 1  ;;  %v582_v43 = vmul.f32 %v581_v38, %v559_v31  ;;  %s1837_s20 = sld [smem:[%s1606_s7 + %s1429_s25]]  ;;  %v588_v44 = vstv %s1813_s8  ;;  %s1430_s3 = smov 388  }
  0x7c   : > { %v592_v45 = vstv %s1818_s30  ;;  %s1842_s18 = sld [smem:[%s1606_s7 + %s1430_s3]]  ;;  %v551_v46 = vadd.f32 %v549_v30, %v544_v39  ;;  %v589_v54 = vmul.f32 %v588_v44, %v562_v37  ;;  %s1431_s11 = smov 516  }
  0x7d   : > { %v575_v48 = vadd.f32 %v573_v40, %v568_v34  ;;  %v584_v49 = vrot.slane %v582_v43, 1  ;;  %v593_v50 = vmul.f32 %v592_v45, %v562_v37  ;;  %s1848_s14 = sld [smem:[%s1614_s15 + %s1427_s23]]  ;;  %v599_v55 = vstv %s1822_s2  ;;  %s1432_s19 = smov 644  }
  0x7e   : > { %v603_v51 = vstv %s1826_s16  ;;  %s1852_s29 = sld [smem:[%s1614_s15 + %s1428_s10]]  ;;  %v552_v52 = vadd.f32 %v551_v46, %v1719_v42  ;;  %v600_v61 = vmul.f32 %v599_v55, %v565_v47  ;;  %s1433_s16 = smov 772  }
  0x7f   : > { %v579_v53 = vadd.f32 %v578_v41, %v575_v48  ;;  %s612_s28 = scalar_lea.vmem %s1622_s24, %s1830_s9 [#allocation8]  ;;  %s1858_s13 = sld [smem:[%s1614_s15 + %s1429_s25]]  ;;  %v604_v56 = vmul.f32 %v603_v51, %v565_v47  ;;  %v595_v58 = vrot.slane %v593_v50, 1 }
  0x80   : > { %s615_s22 = scalar_lea.vmem %s1622_s24, %s1834_s27 [#allocation8]  ;;  %s1864_s8 = sld [smem:[%s1614_s15 + %s1430_s3]]  ;;  %553 = vst [vmem:[%s1750_s1 + $0x2] sm:$0x1] %v552_v52  ;;  %v613_v59 = vld [vmem:[%s612_s28] sm:$0x3] }
  0x81   : > { %v586_v57 = vadd.f32 %v584_v49, %v579_v53  ;;  %s618_s26 = scalar_lea.vmem %s1629_s12, %s1837_s20 [#allocation9]  ;;  %s1870_s30 = sld [smem:[%s1614_s15 + %s1431_s11]]  ;;  %v606_v63 = vrot.slane %v604_v56, 1  ;;  %v616_v0 = vld [vmem:[%s615_s22] sm:$0x3] }
  0x82   : > { %s621_s17 = scalar_lea.vmem %s1629_s12, %s1842_s18 [#allocation9]  ;;  %s1875_s2 = sld [smem:[%s1614_s15 + %s1432_s19]]  ;;  %v619_v6 = vld [vmem:[%s618_s26] sm:$0x3] }
  0x83   : > { %v590_v60 = vadd.f32 %v589_v54, %v586_v57  ;;  %v624_v62 = vstv %s1848_s14  ;;  %s1879_s23 = sld [smem:[%s1614_s15 + %s1433_s16]]  ;;  %s1434_s9 = smov 900   ;;  %v622_v15 = vld [vmem:[%s621_s17] sm:$0x3] }
  0x84   : > { %v627_v1 = vstv %s1852_s29  ;;  %s1883_s10 = sld [smem:[%s1614_s15 + %s1434_s9]]  ;;  %v625_v3 = vmul.f32 %v624_v62, %v613_v59  ;;  %s1435_s27 = smov 5  }
  0x85   : > { %v597_v2 = vadd.f32 %v595_v58, %v590_v60  ;;  %v628_v4 = vmul.f32 %v627_v1, %v613_v59  ;;  %v634_v5 = vstv %s1858_s13  ;;  %s1887_s25 = sld [smem:[%s1606_s7 + %s1435_s27]]  ;;  %s1436_s20 = smov 133  }
  0x86   : > { %v638_v7 = vstv %s1864_s8  ;;  %s1891_s3 = sld [smem:[%s1606_s7 + %s1436_s20]]  ;;  %v635_v10 = vmul.f32 %v634_v5, %v616_v0  ;;  %s1437_s14 = smov 261  }
  0x87   : > { %v601_v8 = vadd.f32 %v600_v61, %v597_v2  ;;  %v630_v9 = vrot.slane %v628_v4, 1  ;;  %v639_v11 = vmul.f32 %v638_v7, %v616_v0  ;;  %s1894_s29 = sld [smem:[%s1606_s7 + %s1437_s14]]  ;;  %v645_v12 = vstv %s1870_s30  ;;  %s1438_s28 = smov 389  }
  0x88   : > { %v649_v13 = vstv %s1875_s2  ;;  %s1899_s13 = sld [smem:[%s1606_s7 + %s1438_s28]]  ;;  %v646_v22 = vmul.f32 %v645_v12, %v619_v6  ;;  %s1439_s19 = smov 517  }
  0x89   : > { %v608_v14 = vadd.f32 %v606_v63, %v601_v8  ;;  %v632_v16 = vadd.f32 %v630_v9, %v625_v3  ;;  %v641_v17 = vrot.slane %v639_v11, 1  ;;  %v650_v18 = vmul.f32 %v649_v13, %v619_v6  ;;  %s1905_s22 = sld [smem:[%s1614_s15 + %s1435_s27]]  ;;  %s1440_s9 = smov 645  }
  0x8a   : > { %v660_v19 = vstv %s1883_s10  ;;  %s1909_s8 = sld [smem:[%s1614_s15 + %s1436_s20]]  ;;  %v656_v23 = vstv %s1879_s23  ;;  %s1441_s10 = smov 773  }
  0x8b   : > { %v609_v20 = vadd.f32 %v608_v14, %v1719_v42  ;;  %v636_v21 = vadd.f32 %v635_v10, %v632_v16  ;;  %s669_s18 = scalar_lea.vmem %s1622_s24, %s1887_s25 [#allocation8]  ;;  %s1915_s26 = sld [smem:[%s1614_s15 + %s1437_s14]]  ;;  %v661_v24 = vmul.f32 %v660_v19, %v622_v15  ;;  %v652_v26 = vrot.slane %v650_v18, 1 }
  0x8c   : > { %s672_s11 = scalar_lea.vmem %s1622_s24, %s1891_s3 [#allocation8]  ;;  %s1921_s30 = sld [smem:[%s1614_s15 + %s1438_s28]]  ;;  %v670_v27 = vld [vmem:[%s669_s18] sm:$0x3]  ;;  %v657_v29 = vmul.f32 %v656_v23, %v622_v15 }
  0x8d   : > { %610 = vst [vmem:[%s1750_s1 + $0x3] sm:$0x1] %v609_v20  ;;  %v643_v25 = vadd.f32 %v641_v17, %v636_v21  ;;  %s675_s17 = scalar_lea.vmem %s1629_s12, %s1894_s29 [#allocation9]  ;;  %s1927_s2 = sld [smem:[%s1614_s15 + %s1439_s19]]  ;;  %v663_v31 = vrot.slane %v661_v24, 1  ;;  %v673_v32 = vld [vmem:[%s672_s11] sm:$0x3] }
  0x8e   : > { %s678_s16 = scalar_lea.vmem %s1629_s12, %s1899_s13 [#allocation9]  ;;  %s1932_s23 = sld [smem:[%s1614_s15 + %s1440_s9]]  ;;  %v676_v38 = vld [vmem:[%s675_s17] sm:$0x3] }
  0x8f   : > { %v647_v28 = vadd.f32 %v646_v22, %v643_v25  ;;  %v681_v30 = vstv %s1905_s22  ;;  %s1936_s27 = sld [smem:[%s1614_s15 + %s1441_s10]]  ;;  %s1442_s25 = smov 901   ;;  %v679_v48 = vld [vmem:[%s678_s16] sm:$0x3] }
  0x90   : > { %v684_v33 = vstv %s1909_s8  ;;  %s1940_s20 = sld [smem:[%s1614_s15 + %s1442_s25]]  ;;  %v682_v35 = vmul.f32 %v681_v30, %v670_v27  ;;  %s1443_s3 = smov 6  }
  0x91   : > { %v654_v34 = vadd.f32 %v652_v26, %v647_v28  ;;  %v685_v36 = vmul.f32 %v684_v33, %v670_v27  ;;  %v691_v37 = vstv %s1915_s26  ;;  %s1944_s14 = sld [smem:[%s1606_s7 + %s1443_s3]]  ;;  %s1444_s29 = smov 134  }
  0x92   : > { %v695_v39 = vstv %s1921_s30  ;;  %s1948_s28 = sld [smem:[%s1606_s7 + %s1444_s29]]  ;;  %v692_v43 = vmul.f32 %v691_v37, %v673_v32  ;;  %s1445_s22 = smov 262  }
  0x93   : > { %v658_v40 = vadd.f32 %v657_v29, %v654_v34  ;;  %v687_v41 = vrot.slane %v685_v36, 1  ;;  %v696_v44 = vmul.f32 %v695_v39, %v673_v32  ;;  %s1951_s8 = sld [smem:[%s1606_s7 + %s1445_s22]]  ;;  %v702_v45 = vstv %s1927_s2  ;;  %s1446_s18 = smov 390  }
  0x94   : > { %v706_v46 = vstv %s1932_s23  ;;  %s1956_s26 = sld [smem:[%s1606_s7 + %s1446_s18]]  ;;  %v703_v55 = vmul.f32 %v702_v45, %v676_v38  ;;  %s1447_s9 = smov 518  }
  0x95   : > { %v665_v47 = vadd.f32 %v663_v31, %v658_v40  ;;  %v689_v49 = vadd.f32 %v687_v41, %v682_v35  ;;  %v698_v50 = vrot.slane %v696_v44, 1  ;;  %v707_v51 = vmul.f32 %v706_v46, %v676_v38  ;;  %s1962_s11 = sld [smem:[%s1614_s15 + %s1443_s3]]  ;;  %s1448_s25 = smov 646  }
  0x96   : > { %v717_v52 = vstv %s1940_s20  ;;  %s1966_s30 = sld [smem:[%s1614_s15 + %s1444_s29]]  ;;  %v713_v56 = vstv %s1936_s27  ;;  %s1449_s20 = smov 774  }
  0x97   : > { %v666_v53 = vadd.f32 %v665_v47, %v1719_v42  ;;  %v693_v54 = vadd.f32 %v692_v43, %v689_v49  ;;  %s726_s13 = scalar_lea.vmem %s1622_s24, %s1944_s14 [#allocation8]  ;;  %s1972_s17 = sld [smem:[%s1614_s15 + %s1445_s22]]  ;;  %v718_v57 = vmul.f32 %v717_v52, %v679_v48  ;;  %v709_v59 = vrot.slane %v707_v51, 1 }
  0x98   : > { %s729_s19 = scalar_lea.vmem %s1622_s24, %s1948_s28 [#allocation8]  ;;  %s1978_s2 = sld [smem:[%s1614_s15 + %s1446_s18]]  ;;  %v727_v60 = vld [vmem:[%s726_s13] sm:$0x3]  ;;  %v714_v62 = vmul.f32 %v713_v56, %v679_v48 }
  0x99   : > { %667 = vst [vmem:[%s1750_s1 + $0x4] sm:$0x1] %v666_v53  ;;  %v700_v58 = vadd.f32 %v698_v50, %v693_v54  ;;  %s732_s16 = scalar_lea.vmem %s1629_s12, %s1951_s8 [#allocation9]  ;;  %s1984_s23 = sld [smem:[%s1614_s15 + %s1447_s9]]  ;;  %v720_v0 = vrot.slane %v718_v57, 1  ;;  %v730_v1 = vld [vmem:[%s729_s19] sm:$0x3] }
  0x9a   : > { %s735_s10 = scalar_lea.vmem %s1629_s12, %s1956_s26 [#allocation9]  ;;  %s1989_s27 = sld [smem:[%s1614_s15 + %s1448_s25]]  ;;  %v733_v7 = vld [vmem:[%s732_s16] sm:$0x3] }
  0x9b   : > { %v704_v61 = vadd.f32 %v703_v55, %v700_v58  ;;  %v738_v63 = vstv %s1962_s11  ;;  %s1993_s3 = sld [smem:[%s1614_s15 + %s1449_s20]]  ;;  %s1450_s14 = smov 902   ;;  %v736_v16 = vld [vmem:[%s735_s10] sm:$0x3] }
  0x9c   : > { %v741_v2 = vstv %s1966_s30  ;;  %s1997_s29 = sld [smem:[%s1614_s15 + %s1450_s14]]  ;;  %v739_v4 = vmul.f32 %v738_v63, %v727_v60  ;;  %s1451_s28 = smov 7  }
  0x9d   : > { %v711_v3 = vadd.f32 %v709_v59, %v704_v61  ;;  %v742_v5 = vmul.f32 %v741_v2, %v727_v60  ;;  %v748_v6 = vstv %s1972_s17  ;;  %s2001_s22 = sld [smem:[%s1606_s7 + %s1451_s28]]  ;;  %s1452_s8 = smov 135  }
  0x9e   : > { %v752_v8 = vstv %s1978_s2  ;;  %s2005_s18 = sld [smem:[%s1606_s7 + %s1452_s8]]  ;;  %v749_v11 = vmul.f32 %v748_v6, %v730_v1  ;;  %s1453_s11 = smov 263  }
  0x9f   : > { %v715_v9 = vadd.f32 %v714_v62, %v711_v3  ;;  %v744_v10 = vrot.slane %v742_v5, 1  ;;  %v753_v12 = vmul.f32 %v752_v8, %v730_v1  ;;  %s2008_s30 = sld [smem:[%s1606_s7 + %s1453_s11]]  ;;  %v759_v13 = vstv %s1984_s23  ;;  %s1454_s13 = smov 391  }
  0xa0   : > { %v763_v14 = vstv %s1989_s27  ;;  %s2013_s17 = sld [smem:[%s1606_s7 + %s1454_s13]]  ;;  %v760_v23 = vmul.f32 %v759_v13, %v733_v7  ;;  %s1455_s23 = smov 519  }
  0xa1   : > { %v722_v15 = vadd.f32 %v720_v0, %v715_v9  ;;  %v746_v17 = vadd.f32 %v744_v10, %v739_v4  ;;  %v755_v18 = vrot.slane %v753_v12, 1  ;;  %v764_v19 = vmul.f32 %v763_v14, %v733_v7  ;;  %s2019_s19 = sld [smem:[%s1614_s15 + %s1451_s28]]  ;;  %s1456_s27 = smov 647  }
  0xa2   : > { %v774_v20 = vstv %s1997_s29  ;;  %s2023_s2 = sld [smem:[%s1614_s15 + %s1452_s8]]  ;;  %v770_v24 = vstv %s1993_s3  ;;  %s1457_s3 = smov 775  }
  0xa3   : > { %v723_v21 = vadd.f32 %v722_v15, %v1719_v42  ;;  %v750_v22 = vadd.f32 %v749_v11, %v746_v17  ;;  %s783_s7 = scalar_lea.vmem %s1622_s24, %s2001_s22 [#allocation8]  ;;  %s2029_s26 = sld [smem:[%s1614_s15 + %s1453_s11]]  ;;  %v775_v25 = vmul.f32 %v774_v20, %v736_v16  ;;  %v766_v27 = vrot.slane %v764_v19, 1 }
  0xa4   : > { %s2033_s16 = sld [smem:[%s1614_s15 + %s1454_s13]]  ;;  %s786_s9 = scalar_lea.vmem %s1622_s24, %s2005_s18 [#allocation8]  ;;  %v784_v28 = vld [vmem:[%s783_s7] sm:$0x3]  ;;  %v771_v30 = vmul.f32 %v770_v24, %v736_v16 }
  0xa5   : > { %724 = vst [vmem:[%s1750_s1 + $0x5] sm:$0x1] %v723_v21  ;;  %v757_v26 = vadd.f32 %v755_v18, %v750_v22  ;;  %s2039_s10 = sld [smem:[%s1614_s15 + %s1455_s23]]  ;;  %s789_s25 = scalar_lea.vmem %s1629_s12, %s2008_s30 [#allocation9]  ;;  %v777_v32 = vrot.slane %v775_v25, 1  ;;  %v787_v33 = vld [vmem:[%s786_s9] sm:$0x3] }
  0xa6   : > { %s819_s20 = sld [smem:[%s1614_s15 + %s1456_s27]]  ;;  %s1458_s24 = smov 903   ;;  %v790_v39 = vld [vmem:[%s789_s25] sm:$0x3] }
  0xa7   : > { %v761_v29 = vadd.f32 %v760_v23, %v757_v26  ;;  %v795_v31 = vstv %s2019_s19  ;;  %s2046_s14 = sld [smem:[%s1614_s15 + %s1457_s3]]  ;;  %s792_s28 = scalar_lea.vmem %s1629_s12, %s2013_s17 [#allocation9] }
  0xa8   : > { %v798_v34 = vstv %s2023_s2  ;;  %s830_s29 = sld [smem:[%s1614_s15 + %s1458_s24]]  ;;  %v796_v36 = vmul.f32 %v795_v31, %v784_v28  ;;  %v793_v52 = vld [vmem:[%s792_s28] sm:$0x3]  ;;  %s1061_s15 = sshll.u32 %s1384_s21, 3 }
  0xa9   : > { %v768_v35 = vadd.f32 %v766_v27, %v761_v29  ;;  %v799_v37 = vmul.f32 %v798_v34, %v784_v28  ;;  %v805_v38 = vstv %s2029_s26  ;;  %s851_s8 = scalar_lea.hbm %s2104_s5, %s1061_s15  ;;  %s853_s18 = sshll.u32 %s1750_s1, 4  ;;  %s854_s18 = int_to_ptr.vmem [resolvable:$true] %s853_s18 }
  0xaa   : > { %v809_v40 = vstv %s2033_s16  ;;  %v806_v44 = vmul.f32 %v805_v38, %v787_v33  ;;  %s855_s11 = sshll.u32 %s851_s8, 4  ;;  %s840_s30 = scalar_lea.sflag [#allocation4], %s1602_s0  ;;  %s856_s11 = int_to_ptr.hbm [resolvable:$true] %s855_s11 }
  0xab   : > { %v772_v41 = vadd.f32 %v771_v30, %v768_v35  ;;  %v801_v43 = vrot.slane %v799_v37, 1  ;;  %v810_v45 = vmul.f32 %v809_v40, %v787_v33  ;;  %v816_v46 = vstv %s2039_s10  ;;  %s1312_s21 = sshra.s32 %s856_s11, 4  ;;  %s1318_s2 = scalar_lea.hbm %s2104_s5, 16  ;;  %s1313_s21 = int_to_ptr.hbm [resolvable:$true] %s1312_s21 }
  0xac   : > { %v820_v47 = vstv %s819_s20  ;;  %v817_v56 = vmul.f32 %v816_v46, %v790_v39  ;;  %s1314_s13 = scalar_lea.hbm %s1313_s21, 8  ;;  %p1319_p7 = scmp.lt.s32.totalorder %s1313_s21, %s2104_s5 }
  0xad   : > { %v779_v48 = vadd.f32 %v777_v32, %v772_v41  ;;  %v803_v49 = vadd.f32 %v801_v43, %v796_v36  ;;  %v812_v50 = vrot.slane %v810_v45, 1  ;;  %v821_v51 = vmul.f32 %v820_v47, %v790_v39  ;;  %p1315_p4 = scmp.ne.s32.totalorder %s1313_s21, %s1314_s13  ;;  %p1320_p8 = scmp.lt.s32.totalorder %s1318_s2, %s1314_s13 }
  0xae   : > { %v831_v53 = vstv %s830_s29  ;;  %v827_v57 = vstv %s2046_s14 }
  0xaf   : > { %v780_v54 = vadd.f32 %v779_v48, %v1719_v42  ;;  %v807_v55 = vadd.f32 %v806_v44, %v803_v49  ;;  %v823_v59 = vrot.slane %v821_v51, 1  ;;  %v832_v60 = vmul.f32 %v831_v53, %v793_v52  ;;  %p1316_p5 = pnand %p1315_p4, %p1540_p9  ;;  %p1321_p10 = por %p1320_p8, %p1319_p7 }
  0xb0   : > { %v828_v62 = vmul.f32 %v827_v57, %v793_v52 }
  0xb1   : > { %781 = vst [vmem:[%s1750_s1 + $0x6] sm:$0x1] %v780_v54  ;;  %v814_v58 = vadd.f32 %v812_v50, %v807_v55  ;;  %v834_v0 = vrot.slane %v832_v60, 1  ;;  %p1317_p6 = pneg %p1316_p5 }
  0xb3   : > { %v818_v61 = vadd.f32 %v817_v56, %v814_v58  ;;  %p1322_p13 = pnand %p1321_p10, %p1317_p6 }
  0xb5   : > { %v825_v63 = vadd.f32 %v823_v59, %v818_v61 }
  0xb7   : > { %v829_v1 = vadd.f32 %v828_v62, %v825_v63 }
  0xb9   : > { %v836_v2 = vadd.f32 %v834_v0, %v829_v1 }
  0xbb   : > { %v837_v3 = vadd.f32 %v836_v2, %v1719_v42 }
  0xbd   : > { %838 = vst [vmem:[%s1750_s1 + $0x7] sm:$0x1] %v837_v3 }
  0xbe   : > { %1325 = shalt.err (!%p1322_p13)
}
  0xbf   : > { %1074 = dma.vmem_to_hbm [thread:$0]  (%p1540_p9), %s854_s18, 128, %s856_s11, %s840_s30  }
  0xc0 PF: > { %s2136_s0 = sld [smem:[#allocation17_spill]]  ;;  %p1090_p0 = pnand %p1041_p12, %p1547_p11 }
  0xc1   : > { %s2138_s16 = sld [smem:[#allocation21_spill]] }
  0xc2   : > { %p1091_p1 = pneg %p1090_p0 }
  0xc6   : > { %s867_s9 = sand.u32 1, %s2136_s0  }
  0xc7   : > { %s868_s23 = scalar_lea.sflag [#allocation4], %s867_s9 }
  0xc8   : > { %1367 = dma.done.wait (%p1091_p1), %s868_s23, 128  }
  0xc9   : > { %1369 = vsyncadd (%p1091_p1), %s868_s23, 4294967168  ;;  %s30_s23 = sadd.s32 1, %s2138_s16   ;;  %s2139_s18 = sld [smem:[#allocation18_spill]] }
  0xca   : > { %p27_p2 = scmp.ge.s32.totalorder %s30_s23, 4   ;;  %s2140_s19 = sld [smem:[#allocation19_spill]] }
  0xcb   : > { %s2141_s20 = sld [smem:[#allocation23_spill]] }
  0xcc   : > { %s2142_s21 = sld [smem:[#allocation20_spill]]  ;;  %29 = sbr.rel (!%p27_p2) target bundleno = 17 (0x11), region = 156 }
  0xcd   : > { %s2143_s22 = sld [smem:[#allocation22_spill]] }
  0xd1   :  { %874 = vsyncpa [#allocation3], 1 }
  0xd2   :  { %876 = vsyncpa [#allocation3 + $0x1], 1 }
  0xd3   :  { %877 = vsyncpa [#allocation10], 1 }
  0xd4   :  { %879 = vsyncpa [#allocation10 + $0x1], 1 }
  0xd5   :  { %880 = vsyncpa [#allocation4], 1 }
  0xd6   :  { %882 = vsyncpa [#allocation4 + $0x1], 1 }
  0xd7   :  { %883 = vsyncpa [#allocation5], 1 }
  0xd8   :  { %885 = vsyncpa [#allocation5 + $0x1], 1 }
  0xd9   :  { %886 = vsyncpa [#allocation7], 1 }
  0xda   :  { %888 = vsyncpa [#allocation7 + $0x1], 1 }

</bundles_post_ra>
